<compile_context>
chip_gen: v7x
topology: tpu7x:2x2x1
jax: 0.10.0
libtpu: 0.0.40
codegen_flags: <defaults>
</compile_context>

<pallas_src>
import functools

import jax
import jax.numpy as jnp
from jax.experimental import pallas as pl
from jax.experimental.pallas import tpu as pltpu


def _down_layer_kernel(x_ref, xt_ref, xb_ref, w1_ref, b1_ref, w2_ref, b2_ref,
                       o_ref, xpad_ref, im1_ref, ypad_ref, im2_ref,
                       *, th, wc, n_ht, do_pool):
    """One (batch, row-tile) step of MaxPool2d(2) -> conv3x3+ReLU -> conv3x3+ReLU.

    x_ref  : (1, 2*th, wc, 2*cin) pre-pool rows of this tile (pool pairs pre-folded
             along W: lanes [0:cin] = even cols, lanes [cin:2cin] = odd cols)
    xt_ref : (1, 4, wc, 2*cin) pre-pool rows of the 2-pooled-row TOP halo
    xb_ref : (1, 4, wc, 2*cin) pre-pool rows of the 2-pooled-row BOTTOM halo
             (for do_pool=False the blocks are un-pooled (1, th / 2 / 2, wc, cin))
    w1_ref : (3, 3*cin, c1)  per-kh weight slabs, rows ordered (kw, ci)
    w2_ref : (3, 3*c1,  c2)
    b1_ref : (1, c1) f32     b2_ref : (1, c2) f32
    o_ref  : (1, th, wc, c2)
    scratch (bf16): xpad (th+4, wc+2, cin), im1 (th+4, wc, 3*cin),
                    ypad (th+2, wc+2, c1),  im2 (th+2, wc, 3*c1)
    """
    cin = w1_ref.shape[1] // 3
    c1 = w1_ref.shape[2]
    c2 = w2_ref.shape[2]
    r1 = th + 2                                   # conv1 rows computed per tile
    t = pl.program_id(1)
    cdt = xpad_ref.dtype

    def pool2(v):                                 # (2r, wc, 2*cin) -> (r, wc, cin)
        vw = jnp.maximum(v[:, :, :cin], v[:, :, cin:])     # pool along W (lanes)
        vr = vw.reshape(v.shape[0] // 2, 2, wc, cin)        # free leading split
        return jnp.maximum(vr[:, 0], vr[:, 1])              # pool along H

    # --- border-only zeroing, EVERY step (scratch is per-core and persists; a
    # --- program_id==0 gate would be wrong under core-parallel sharding) -----
    xpad_ref[:, 0:1, :] = jnp.zeros((th + 4, 1, cin), cdt)
    xpad_ref[:, wc + 1:wc + 2, :] = jnp.zeros((th + 4, 1, cin), cdt)
    ypad_ref[:, 0:1, :] = jnp.zeros((r1, 1, c1), cdt)
    ypad_ref[:, wc + 1:wc + 2, :] = jnp.zeros((r1, 1, c1), cdt)

    # --- MaxPool2d(2) of this tile + its 2-pooled-row halos -------------------
    if do_pool:
        main = pool2(x_ref[0])                    # (th, wc, cin)
        top = pool2(xt_ref[0])                    # (2,  wc, cin)
        bot = pool2(xb_ref[0])                    # (2,  wc, cin)
    else:
        main, top, bot = x_ref[0], xt_ref[0], xb_ref[0]

    # xpad rows: [0:2] top halo, [2:th+2] tile rows, [th+2:th+4] bottom halo.
    # Halo rows outside the image become the conv1 SAME zero padding.
    xpad_ref[2:th + 2, 1:wc + 1, :] = main
    xpad_ref[0:2, 1:wc + 1, :] = jnp.where(t > 0, top, jnp.zeros_like(top))
    xpad_ref[th + 2:th + 4, 1:wc + 1, :] = jnp.where(t < n_ht - 1, bot,
                                                     jnp.zeros_like(bot))

    # --- conv1 (+ReLU): partial im2col (3 shifted copies), 3 dots of K=3*cin --
    for kw in range(3):
        im1_ref[:, :, kw * cin:(kw + 1) * cin] = xpad_ref[:, kw:kw + wc, :]
    acc1 = None
    for kh in range(3):
        lhs = im1_ref[kh:kh + r1, :, :].reshape(r1 * wc, 3 * cin)
        part = jnp.dot(lhs, w1_ref[kh], preferred_element_type=jnp.float32)
        acc1 = part if acc1 is None else acc1 + part
    y1 = jnp.maximum(acc1 + b1_ref[...], 0.0)                  # (r1*wc, c1) f32
    ypad_ref[:, 1:wc + 1, :] = y1.astype(cdt).reshape(r1, wc, c1)

    # rows 0 / r1-1 of ypad are conv2's SAME zero padding at the image border
    @pl.when(t == 0)
    def _():
        ypad_ref[0:1, :, :] = jnp.zeros((1, wc + 2, c1), cdt)

    @pl.when(t == n_ht - 1)
    def _():
        ypad_ref[r1 - 1:r1, :, :] = jnp.zeros((1, wc + 2, c1), cdt)

    # --- conv2 (+ReLU): same partial-im2col scheme, K=3*c1 --------------------
    for kw in range(3):
        im2_ref[:, :, kw * c1:(kw + 1) * c1] = ypad_ref[:, kw:kw + wc, :]
    acc2 = None
    for kh in range(3):
        lhs = im2_ref[kh:kh + th, :, :].reshape(th * wc, 3 * c1)
        part = jnp.dot(lhs, w2_ref[kh], preferred_element_type=jnp.float32)
        acc2 = part if acc2 is None else acc2 + part
    y2 = jnp.maximum(acc2 + b2_ref[...], 0.0)                  # (th*wc, c2) f32
    o_ref[0] = y2.astype(o_ref.dtype).reshape(th, wc, c2)


def _tile_vmem_bytes(th, wc, cin, c1, c2, out_itemsize, do_pool):
    """Rough per-step VMEM footprint: double-buffered blocks + scratch + f32 temps."""
    cdt = 2                                        # bf16 bytes
    rows_in = 2 * th if do_pool else th
    lane_cin = 2 * cin if do_pool else cin
    halo_rows = 4 if do_pool else 2
    blocks = (rows_in * wc * lane_cin * cdt                    # x tile
              + 2 * halo_rows * wc * lane_cin * cdt            # halo windows
              + th * wc * c2 * out_itemsize                    # output tile
              + (9 * cin * c1 + 9 * c1 * c2) * cdt + (c1 + c2) * 4)
    scratch = ((th + 4) * (wc + 2) * cin * cdt                 # xpad
               + (th + 4) * wc * 3 * cin * cdt                 # im1
               + (th + 2) * (wc + 2) * c1 * cdt                # ypad
               + (th + 2) * wc * 3 * c1 * cdt)                 # im2
    temps = (th + 2) * wc * c1 * 4 + th * wc * c2 * 4          # f32 accumulators
    return 2 * blocks + scratch + temps


def _choose_row_tile(hc, wc, cin, c1, c2, out_itemsize, do_pool, vmem_cap):
    """Largest even divisor of hc whose per-step footprint fits the VMEM budget."""
    if not do_pool or hc % 2 != 0:
        return hc, 1                               # degenerate / odd: single tile
    budget = max(16 << 20, min(48 << 20, vmem_cap // 2))
    cap = hc // 2 if hc >= 8 else hc               # prefer >=2 row-tiles when sensible
    best = None
    for d in range(2, hc + 1, 2):
        if hc % d == 0 and d <= cap:
            if _tile_vmem_bytes(d, wc, cin, c1, c2, out_itemsize, do_pool) <= budget:
                best = d
    if best is None:                               # even the smallest tile over budget
        best = 2
    return best, hc // best


def _vmem_capacity_bytes():
    try:
        return int(pltpu.get_tpu_info().vmem_capacity_bytes)
    except Exception:
        return 64 * 1024 * 1024                    # conservative (v7x per-core VMEM)


@functools.partial(jax.jit, static_argnames=("compute_dtype",))
def down_layer_forward(x_nchw, w1, b1, w2, b2, compute_dtype=jnp.bfloat16):
    """PyTorch DownLayer forward: MaxPool2d(2) -> (conv3x3+ReLU) x 2 (no BN).

    Matches the module: the pool is skipped when H <= 1 or W <= 1 (the PyTorch
    forward bypasses MaxPool2d in that case).  I/O is NCHW like PyTorch.
    """
    N, cin, H, W = x_nchw.shape
    c1 = w1.shape[-1]
    c2 = w2.shape[-1]
    out_dtype = x_nchw.dtype
    out_itemsize = jnp.dtype(out_dtype).itemsize
    do_pool = (H > 1) and (W > 1)
    hc, wc = (H // 2, W // 2) if do_pool else (H, W)

    # NCHW -> NHWC once, cast to bf16 (halves input DMA; matmul operands are bf16
    # anyway and max-pool commutes with the rounding).
    # TODO(synk): accept/emit NHWC directly when stacking DownLayers so the two
    # transpose passes only happen at model boundaries.
    x = jnp.transpose(x_nchw, (0, 2, 3, 1)).astype(compute_dtype)
    if do_pool:
        # drop a trailing odd row/col (MaxPool2d floor), then a free row-major
        # reshape that puts each horizontal 2x1 pool pair on the lane dim.
        x = x[:, :2 * hc, :2 * wc, :].reshape(N, 2 * hc, wc, 2 * cin)
        lane_cin, halo_rows = 2 * cin, 4
    else:
        lane_cin, halo_rows = cin, 2

    vmem_cap = _vmem_capacity_bytes()
    th, n_ht = _choose_row_tile(hc, wc, cin, c1, c2, out_itemsize, do_pool, vmem_cap)
    rows_in = 2 * th if do_pool else th

    # per-kh weight slabs; rows ordered (kw, ci) to match the partial-im2col lanes
    w1r = w1.reshape(3, 3 * cin, c1).astype(compute_dtype)
    w2r = w2.reshape(3, 3 * c1, c2).astype(compute_dtype)
    b1r = b1.reshape(1, c1).astype(jnp.float32)
    b2r = b2.reshape(1, c2).astype(jnp.float32)

    if n_ht > 1:
        # halo windows are small clamped views of the same input array; the kernel
        # replaces them with zeros at the image border (t == 0 / t == n_ht - 1).
        x_top, x_bot = x, x
        hblk = th // 2                              # halo stride in 4-row blocks
        top_spec = pl.BlockSpec(
            (1, 4, wc, lane_cin),
            lambda n, t: (n, jnp.maximum(t * hblk - 1, 0), 0, 0))
        bot_spec = pl.BlockSpec(
            (1, 4, wc, lane_cin),
            lambda n, t: (n, jnp.minimum((t + 1) * hblk, hc // 2 - 1), 0, 0))
    else:
        # single row-tile: the halos are pure zero padding
        x_top = jnp.zeros((N, halo_rows, wc, lane_cin), compute_dtype)
        x_bot = x_top
        top_spec = pl.BlockSpec((1, halo_rows, wc, lane_cin),
                                lambda n, t: (n, 0, 0, 0))
        bot_spec = pl.BlockSpec((1, halo_rows, wc, lane_cin),
                                lambda n, t: (n, 0, 0, 0))

    kernel = functools.partial(_down_layer_kernel, th=th, wc=wc, n_ht=n_ht,
                               do_pool=do_pool)

    est = _tile_vmem_bytes(th, wc, cin, c1, c2, out_itemsize, do_pool)
    vmem_limit = min(max(32 << 20, int(est * 1.5) + (4 << 20)),
                     max(32 << 20, vmem_cap - (8 << 20)))

    flops = 2 * 9 * hc * wc * (cin * c1 + c1 * c2) * N
    bytes_accessed = (x.size * x.dtype.itemsize
                      + N * hc * wc * c2 * out_itemsize
                      + (w1r.size + w2r.size) * 2 + (c1 + c2) * 4)

    out = pl.pallas_call(
        kernel,
        out_shape=jax.ShapeDtypeStruct((N, hc, wc, c2), out_dtype),
        grid=(N, n_ht),
        in_specs=[
            pl.BlockSpec((1, rows_in, wc, lane_cin), lambda n, t: (n, t, 0, 0)),
            top_spec,
            bot_spec,
            pl.BlockSpec((3, 3 * cin, c1), lambda n, t: (0, 0, 0)),
            pl.BlockSpec((1, c1), lambda n, t: (0, 0)),
            pl.BlockSpec((3, 3 * c1, c2), lambda n, t: (0, 0, 0)),
            pl.BlockSpec((1, c2), lambda n, t: (0, 0)),
        ],
        out_specs=pl.BlockSpec((1, th, wc, c2), lambda n, t: (n, t, 0, 0)),
        scratch_shapes=[
            pltpu.VMEM((th + 4, wc + 2, cin), compute_dtype),   # padded pooled rows
            pltpu.VMEM((th + 4, wc, 3 * cin), compute_dtype),   # partial im2col, conv1
            pltpu.VMEM((th + 2, wc + 2, c1), compute_dtype),    # padded conv1 rows
            pltpu.VMEM((th + 2, wc, 3 * c1), compute_dtype),    # partial im2col, conv2
        ],
        compiler_params=pltpu.CompilerParams(
            dimension_semantics=("parallel", "parallel"),
            vmem_limit_bytes=int(vmem_limit)),
        cost_estimate=pl.CostEstimate(flops=int(flops), transcendentals=0,
                                      bytes_accessed=int(bytes_accessed)),
    )(x, x_top, x_bot, w1r, b1r, w2r, b2r)

    return jnp.transpose(out, (0, 3, 1, 2))         # NHWC -> NCHW


class DownLayerPallas:
    """MaxPool2d(2) -> DoubleConv (conv3x3 + ReLU, twice; the module has no BN)."""

    def __init__(self, in_ch, out_ch, key):
        k1, k2, k3, k4 = jax.random.split(key, 4)
        # PyTorch-style uniform init, bound 1/sqrt(fan_in); weights stored HWIO
        s1 = 1.0 / (in_ch * 9) ** 0.5
        s2 = 1.0 / (out_ch * 9) ** 0.5
        self.w1 = jax.random.uniform(k1, (3, 3, in_ch, out_ch), jnp.float32, -s1, s1)
        self.b1 = jax.random.uniform(k2, (out_ch,), jnp.float32, -s1, s1)
        self.w2 = jax.random.uniform(k3, (3, 3, out_ch, out_ch), jnp.float32, -s2, s2)
        self.b2 = jax.random.uniform(k4, (out_ch,), jnp.float32, -s2, s2)

    def __call__(self, x_nchw):
        return down_layer_forward(x_nchw, self.w1, self.b1, self.w2, self.b2)


# pure-JAX reference for correctness checking
def _reference(x_nchw, w1, b1, w2, b2):
    dn = ("NHWC", "HWIO", "NHWC")
    x = jnp.transpose(x_nchw, (0, 2, 3, 1))
    if x.shape[1] > 1 and x.shape[2] > 1:
        x = jax.lax.reduce_window(x, -jnp.inf, jax.lax.max,
                                  (1, 2, 2, 1), (1, 2, 2, 1), "VALID")
    x = jax.nn.relu(jax.lax.conv_general_dilated(x, w1, (1, 1), "SAME",
                                                 dimension_numbers=dn) + b1)
    x = jax.nn.relu(jax.lax.conv_general_dilated(x, w2, (1, 1), "SAME",
                                                 dimension_numbers=dn) + b2)
    return jnp.transpose(x, (0, 3, 1, 2))


if __name__ == "__main__":
    key = jax.random.PRNGKey(0)
    kx, kp = jax.random.split(key)

    # batch=2, in_ch=4, out_ch=8, 16x16 input (NCHW, like PyTorch).
    # hc=wc=8 -> TH=4, n_ht=2: the multi-tile + halo path is exercised.
    x = jax.random.normal(kx, (2, 4, 16, 16), jnp.float32)
    layer = DownLayerPallas(in_ch=4, out_ch=8, key=kp)

    out = jax.block_until_ready(layer(x))
    assert out.shape == (2, 8, 8, 8), out.shape

    ref = _reference(x, layer.w1, layer.b1, layer.w2, layer.b2)
    # bf16 matmul operands (f32 accumulation) -> loose tolerance vs f32 reference
    if not jnp.allclose(out, ref, atol=3e-2, rtol=3e-2):
        max_err = float(jnp.max(jnp.abs(out - ref)))
        raise AssertionError(f"Pallas DownLayer mismatch (max_err={max_err})")

    print("KERNEL_OK")
</pallas_src>

<mosaic_0001>
module attributes {stable_mosaic.version = 11 : i64} {
  func.func @_down_layer_kernel(%arg0: i32, %arg1: i32, %arg2: memref<1x8x8x8xbf16, #tpu.memory_space<vmem>>, %arg3: memref<1x4x8x8xbf16, #tpu.memory_space<vmem>>, %arg4: memref<1x4x8x8xbf16, #tpu.memory_space<vmem>>, %arg5: memref<3x12x8xbf16, #tpu.memory_space<vmem>>, %arg6: memref<1x8xf32, #tpu.memory_space<vmem>>, %arg7: memref<3x24x8xbf16, #tpu.memory_space<vmem>>, %arg8: memref<1x8xf32, #tpu.memory_space<vmem>>, %arg9: memref<1x4x8x8xf32, #tpu.memory_space<vmem>>, %arg10: memref<8x10x4xbf16, #tpu.memory_space<vmem>>, %arg11: memref<8x8x12xbf16, #tpu.memory_space<vmem>>, %arg12: memref<6x10x8xbf16, #tpu.memory_space<vmem>>, %arg13: memref<6x8x24xbf16, #tpu.memory_space<vmem>>) attributes {dimension_semantics = [#tpu.dimension_semantics<parallel>, #tpu.dimension_semantics<parallel>], iteration_bounds = array<i64: 2, 2>, scalar_prefetch = 0 : i64, scratch_operands = 4 : i64, tpu.core_type = #tpu.core_type<tc>, window_params = [{transform_indices = @transform_0, window_bounds = array<i64: 1, 8, 8, 8>}, {transform_indices = @transform_1, window_bounds = array<i64: 1, 4, 8, 8>}, {transform_indices = @transform_2, window_bounds = array<i64: 1, 4, 8, 8>}, {pipeline_mode = #tpu.pipeline_mode<synchronous>, transform_indices = @transform_3, window_bounds = array<i64: 3, 12, 8>}, {pipeline_mode = #tpu.pipeline_mode<synchronous>, transform_indices = @transform_4, window_bounds = array<i64: 1, 8>}, {pipeline_mode = #tpu.pipeline_mode<synchronous>, transform_indices = @transform_5, window_bounds = array<i64: 3, 24, 8>}, {pipeline_mode = #tpu.pipeline_mode<synchronous>, transform_indices = @transform_6, window_bounds = array<i64: 1, 8>}, {transform_indices = @transform_7, window_bounds = array<i64: 1, 4, 8, 8>}]} {
    %cst = arith.constant 0.000000e+00 : bf16
    %0 = vector.broadcast %cst : bf16 to vector<8x1x4xbf16>
    %c0 = arith.constant 0 : index
    %c0_0 = arith.constant 0 : index
    %c0_1 = arith.constant 0 : index
    %1 = vector.load %arg10[%c0, %c0_0, %c0_1] : memref<8x10x4xbf16, #tpu.memory_space<vmem>>, vector<8x1x4xbf16>
    tpu.vector_store %arg10[%c0, %c0_0, %c0_1], %0 {strides = array<i32>} : memref<8x10x4xbf16, #tpu.memory_space<vmem>>, vector<8x1x4xbf16>,
    %cst_2 = arith.constant 0.000000e+00 : bf16
    %2 = vector.broadcast %cst_2 : bf16 to vector<8x1x4xbf16>
    %c0_3 = arith.constant 0 : index
    %c9 = arith.constant 9 : index
    %c0_4 = arith.constant 0 : index
    %3 = vector.load %arg10[%c0_3, %c9, %c0_4] : memref<8x10x4xbf16, #tpu.memory_space<vmem>>, vector<8x1x4xbf16>
    tpu.vector_store %arg10[%c0_3, %c9, %c0_4], %2 {strides = array<i32>} : memref<8x10x4xbf16, #tpu.memory_space<vmem>>, vector<8x1x4xbf16>,
    %cst_5 = arith.constant 0.000000e+00 : bf16
    %4 = vector.broadcast %cst_5 : bf16 to vector<6x1x8xbf16>
    %c0_6 = arith.constant 0 : index
    %c0_7 = arith.constant 0 : index
    %c0_8 = arith.constant 0 : index
    %5 = vector.load %arg12[%c0_6, %c0_7, %c0_8] : memref<6x10x8xbf16, #tpu.memory_space<vmem>>, vector<6x1x8xbf16>
    tpu.vector_store %arg12[%c0_6, %c0_7, %c0_8], %4 {strides = array<i32>} : memref<6x10x8xbf16, #tpu.memory_space<vmem>>, vector<6x1x8xbf16>,
    %cst_9 = arith.constant 0.000000e+00 : bf16
    %6 = vector.broadcast %cst_9 : bf16 to vector<6x1x8xbf16>
    %c0_10 = arith.constant 0 : index
    %c9_11 = arith.constant 9 : index
    %c0_12 = arith.constant 0 : index
    %7 = vector.load %arg12[%c0_10, %c9_11, %c0_12] : memref<6x10x8xbf16, #tpu.memory_space<vmem>>, vector<6x1x8xbf16>
    tpu.vector_store %arg12[%c0_10, %c9_11, %c0_12], %6 {strides = array<i32>} : memref<6x10x8xbf16, #tpu.memory_space<vmem>>, vector<6x1x8xbf16>,
    %c0_13 = arith.constant 0 : index
    %c0_14 = arith.constant 0 : index
    %c0_15 = arith.constant 0 : index
    %c0_16 = arith.constant 0 : index
    %8 = vector.load %arg2[%c0_13, %c0_14, %c0_15, %c0_16] : memref<1x8x8x8xbf16, #tpu.memory_space<vmem>>, vector<1x8x8x8xbf16>
    %9 = vector.shape_cast %8 : vector<1x8x8x8xbf16> to vector<8x8x8xbf16>
    %10 = vector.extract_strided_slice %9 {offsets = [0, 0, 0], sizes = [8, 8, 4], strides = [1, 1, 1]} : vector<8x8x8xbf16> to vector<8x8x4xbf16>
    %11 = vector.extract_strided_slice %9 {offsets = [0, 0, 4], sizes = [8, 8, 4], strides = [1, 1, 1]} : vector<8x8x8xbf16> to vector<8x8x4xbf16>
    %12 = arith.maximumf %10, %11 : vector<8x8x4xbf16>
    %13 = vector.shape_cast %12 : vector<8x8x4xbf16> to vector<4x2x8x4xbf16>
    %14 = vector.extract_strided_slice %13 {offsets = [0, 0, 0, 0], sizes = [4, 1, 8, 4], strides = [1, 1, 1, 1]} : vector<4x2x8x4xbf16> to vector<4x1x8x4xbf16>
    %15 = vector.shape_cast %14 : vector<4x1x8x4xbf16> to vector<4x8x4xbf16>
    %16 = vector.extract_strided_slice %13 {offsets = [0, 1, 0, 0], sizes = [4, 1, 8, 4], strides = [1, 1, 1, 1]} : vector<4x2x8x4xbf16> to vector<4x1x8x4xbf16>
    %17 = vector.shape_cast %16 : vector<4x1x8x4xbf16> to vector<4x8x4xbf16>
    %18 = arith.maximumf %15, %17 : vector<4x8x4xbf16>
    %c0_17 = arith.constant 0 : index
    %c0_18 = arith.constant 0 : index
    %c0_19 = arith.constant 0 : index
    %c0_20 = arith.constant 0 : index
    %19 = vector.load %arg3[%c0_17, %c0_18, %c0_19, %c0_20] : memref<1x4x8x8xbf16, #tpu.memory_space<vmem>>, vector<1x4x8x8xbf16>
    %20 = vector.shape_cast %19 : vector<1x4x8x8xbf16> to vector<4x8x8xbf16>
    %21 = vector.extract_strided_slice %20 {offsets = [0, 0, 0], sizes = [4, 8, 4], strides = [1, 1, 1]} : vector<4x8x8xbf16> to vector<4x8x4xbf16>
    %22 = vector.extract_strided_slice %20 {offsets = [0, 0, 4], sizes = [4, 8, 4], strides = [1, 1, 1]} : vector<4x8x8xbf16> to vector<4x8x4xbf16>
    %23 = arith.maximumf %21, %22 : vector<4x8x4xbf16>
    %24 = vector.shape_cast %23 : vector<4x8x4xbf16> to vector<2x2x8x4xbf16>
    %25 = vector.extract_strided_slice %24 {offsets = [0, 0, 0, 0], sizes = [2, 1, 8, 4], strides = [1, 1, 1, 1]} : vector<2x2x8x4xbf16> to vector<2x1x8x4xbf16>
    %26 = vector.shape_cast %25 : vector<2x1x8x4xbf16> to vector<2x8x4xbf16>
    %27 = vector.extract_strided_slice %24 {offsets = [0, 1, 0, 0], sizes = [2, 1, 8, 4], strides = [1, 1, 1, 1]} : vector<2x2x8x4xbf16> to vector<2x1x8x4xbf16>
    %28 = vector.shape_cast %27 : vector<2x1x8x4xbf16> to vector<2x8x4xbf16>
    %29 = arith.maximumf %26, %28 : vector<2x8x4xbf16>
    %c0_21 = arith.constant 0 : index
    %c0_22 = arith.constant 0 : index
    %c0_23 = arith.constant 0 : index
    %c0_24 = arith.constant 0 : index
    %30 = vector.load %arg4[%c0_21, %c0_22, %c0_23, %c0_24] : memref<1x4x8x8xbf16, #tpu.memory_space<vmem>>, vector<1x4x8x8xbf16>
    %31 = vector.shape_cast %30 : vector<1x4x8x8xbf16> to vector<4x8x8xbf16>
    %32 = vector.extract_strided_slice %31 {offsets = [0, 0, 0], sizes = [4, 8, 4], strides = [1, 1, 1]} : vector<4x8x8xbf16> to vector<4x8x4xbf16>
    %33 = vector.extract_strided_slice %31 {offsets = [0, 0, 4], sizes = [4, 8, 4], strides = [1, 1, 1]} : vector<4x8x8xbf16> to vector<4x8x4xbf16>
    %34 = arith.maximumf %32, %33 : vector<4x8x4xbf16>
    %35 = vector.shape_cast %34 : vector<4x8x4xbf16> to vector<2x2x8x4xbf16>
    %36 = vector.extract_strided_slice %35 {offsets = [0, 0, 0, 0], sizes = [2, 1, 8, 4], strides = [1, 1, 1, 1]} : vector<2x2x8x4xbf16> to vector<2x1x8x4xbf16>
    %37 = vector.shape_cast %36 : vector<2x1x8x4xbf16> to vector<2x8x4xbf16>
    %38 = vector.extract_strided_slice %35 {offsets = [0, 1, 0, 0], sizes = [2, 1, 8, 4], strides = [1, 1, 1, 1]} : vector<2x2x8x4xbf16> to vector<2x1x8x4xbf16>
    %39 = vector.shape_cast %38 : vector<2x1x8x4xbf16> to vector<2x8x4xbf16>
    %40 = arith.maximumf %37, %39 : vector<2x8x4xbf16>
    %c2 = arith.constant 2 : index
    %c1 = arith.constant 1 : index
    %c0_25 = arith.constant 0 : index
    %41 = vector.load %arg10[%c2, %c1, %c0_25] : memref<8x10x4xbf16, #tpu.memory_space<vmem>>, vector<4x8x4xbf16>
    tpu.vector_store %arg10[%c2, %c1, %c0_25], %18 {strides = array<i32>} : memref<8x10x4xbf16, #tpu.memory_space<vmem>>, vector<4x8x4xbf16>,
    %c0_i32 = arith.constant 0 : i32
    %42 = arith.cmpi sgt, %arg1, %c0_i32 : i32
    %cst_26 = arith.constant 0.000000e+00 : bf16
    %43 = vector.broadcast %cst_26 : bf16 to vector<2x8x4xbf16>
    %44 = arith.select %42, %29, %43 : vector<2x8x4xbf16>
    %c0_27 = arith.constant 0 : index
    %c1_28 = arith.constant 1 : index
    %c0_29 = arith.constant 0 : index
    %45 = vector.load %arg10[%c0_27, %c1_28, %c0_29] : memref<8x10x4xbf16, #tpu.memory_space<vmem>>, vector<2x8x4xbf16>
    tpu.vector_store %arg10[%c0_27, %c1_28, %c0_29], %44 {strides = array<i32>} : memref<8x10x4xbf16, #tpu.memory_space<vmem>>, vector<2x8x4xbf16>,
    %c1_i32 = arith.constant 1 : i32
    %46 = arith.cmpi slt, %arg1, %c1_i32 : i32
    %cst_30 = arith.constant 0.000000e+00 : bf16
    %47 = vector.broadcast %cst_30 : bf16 to vector<2x8x4xbf16>
    %48 = arith.select %46, %40, %47 : vector<2x8x4xbf16>
    %c6 = arith.constant 6 : index
    %c1_31 = arith.constant 1 : index
    %c0_32 = arith.constant 0 : index
    %49 = vector.load %arg10[%c6, %c1_31, %c0_32] : memref<8x10x4xbf16, #tpu.memory_space<vmem>>, vector<2x8x4xbf16>
    tpu.vector_store %arg10[%c6, %c1_31, %c0_32], %48 {strides = array<i32>} : memref<8x10x4xbf16, #tpu.memory_space<vmem>>, vector<2x8x4xbf16>,
    %c0_33 = arith.constant 0 : index
    %c0_34 = arith.constant 0 : index
    %c0_35 = arith.constant 0 : index
    %50 = vector.load %arg10[%c0_33, %c0_34, %c0_35] : memref<8x10x4xbf16, #tpu.memory_space<vmem>>, vector<8x8x4xbf16>
    %c0_36 = arith.constant 0 : index
    %c0_37 = arith.constant 0 : index
    %c0_38 = arith.constant 0 : index
    %51 = vector.load %arg11[%c0_36, %c0_37, %c0_38] : memref<8x8x12xbf16, #tpu.memory_space<vmem>>, vector<8x8x4xbf16>
    tpu.vector_store %arg11[%c0_36, %c0_37, %c0_38], %50 {strides = array<i32>} : memref<8x8x12xbf16, #tpu.memory_space<vmem>>, vector<8x8x4xbf16>,
    %c0_39 = arith.constant 0 : index
    %c1_40 = arith.constant 1 : index
    %c0_41 = arith.constant 0 : index
    %52 = vector.load %arg10[%c0_39, %c1_40, %c0_41] : memref<8x10x4xbf16, #tpu.memory_space<vmem>>, vector<8x8x4xbf16>
    %c0_42 = arith.constant 0 : index
    %c0_43 = arith.constant 0 : index
    %c4 = arith.constant 4 : index
    %53 = vector.load %arg11[%c0_42, %c0_43, %c4] : memref<8x8x12xbf16, #tpu.memory_space<vmem>>, vector<8x8x4xbf16>
    tpu.vector_store %arg11[%c0_42, %c0_43, %c4], %52 {strides = array<i32>} : memref<8x8x12xbf16, #tpu.memory_space<vmem>>, vector<8x8x4xbf16>,
    %c0_44 = arith.constant 0 : index
    %c2_45 = arith.constant 2 : index
    %c0_46 = arith.constant 0 : index
    %54 = vector.load %arg10[%c0_44, %c2_45, %c0_46] : memref<8x10x4xbf16, #tpu.memory_space<vmem>>, vector<8x8x4xbf16>
    %c0_47 = arith.constant 0 : index
    %c0_48 = arith.constant 0 : index
    %c8 = arith.constant 8 : index
    %55 = vector.load %arg11[%c0_47, %c0_48, %c8] : memref<8x8x12xbf16, #tpu.memory_space<vmem>>, vector<8x8x4xbf16>
    tpu.vector_store %arg11[%c0_47, %c0_48, %c8], %54 {strides = array<i32>} : memref<8x8x12xbf16, #tpu.memory_space<vmem>>, vector<8x8x4xbf16>,
    %c0_49 = arith.constant 0 : index
    %c0_50 = arith.constant 0 : index
    %c0_51 = arith.constant 0 : index
    %56 = vector.load %arg11[%c0_49, %c0_50, %c0_51] : memref<8x8x12xbf16, #tpu.memory_space<vmem>>, vector<6x8x12xbf16>
    %57 = vector.shape_cast %56 : vector<6x8x12xbf16> to vector<48x12xbf16>
    %c0_52 = arith.constant 0 : index
    %c0_53 = arith.constant 0 : index
    %c0_54 = arith.constant 0 : index
    %58 = vector.load %arg5[%c0_52, %c0_53, %c0_54] : memref<3x12x8xbf16, #tpu.memory_space<vmem>>, vector<1x12x8xbf16>
    %59 = vector.shape_cast %58 : vector<1x12x8xbf16> to vector<12x8xbf16>
    %cst_55 = arith.constant dense<0.000000e+00> : vector<48x8xf32>
    %60 = tpu.matmul %57, %59, %cst_55 {dimension_numbers = #tpu.dot_dimension_numbers<[1], [0], [0], [1], [0, 0, 1, 1], [], []>} : vector<48x12xbf16>, vector<12x8xbf16>, vector<48x8xf32> -> vector<48x8xf32>
    %c1_56 = arith.constant 1 : index
    %c0_57 = arith.constant 0 : index
    %c0_58 = arith.constant 0 : index
    %61 = vector.load %arg11[%c1_56, %c0_57, %c0_58] : memref<8x8x12xbf16, #tpu.memory_space<vmem>>, vector<6x8x12xbf16>
    %62 = vector.shape_cast %61 : vector<6x8x12xbf16> to vector<48x12xbf16>
    %c1_59 = arith.constant 1 : index
    %c0_60 = arith.constant 0 : index
    %c0_61 = arith.constant 0 : index
    %63 = vector.load %arg5[%c1_59, %c0_60, %c0_61] : memref<3x12x8xbf16, #tpu.memory_space<vmem>>, vector<1x12x8xbf16>
    %64 = vector.shape_cast %63 : vector<1x12x8xbf16> to vector<12x8xbf16>
    %cst_62 = arith.constant dense<0.000000e+00> : vector<48x8xf32>
    %65 = tpu.matmul %62, %64, %cst_62 {dimension_numbers = #tpu.dot_dimension_numbers<[1], [0], [0], [1], [0, 0, 1, 1], [], []>} : vector<48x12xbf16>, vector<12x8xbf16>, vector<48x8xf32> -> vector<48x8xf32>
    %66 = arith.addf %60, %65 : vector<48x8xf32>
    %c2_63 = arith.constant 2 : index
    %c0_64 = arith.constant 0 : index
    %c0_65 = arith.constant 0 : index
    %67 = vector.load %arg11[%c2_63, %c0_64, %c0_65] : memref<8x8x12xbf16, #tpu.memory_space<vmem>>, vector<6x8x12xbf16>
    %68 = vector.shape_cast %67 : vector<6x8x12xbf16> to vector<48x12xbf16>
    %c2_66 = arith.constant 2 : index
    %c0_67 = arith.constant 0 : index
    %c0_68 = arith.constant 0 : index
    %69 = vector.load %arg5[%c2_66, %c0_67, %c0_68] : memref<3x12x8xbf16, #tpu.memory_space<vmem>>, vector<1x12x8xbf16>
    %70 = vector.shape_cast %69 : vector<1x12x8xbf16> to vector<12x8xbf16>
    %cst_69 = arith.constant dense<0.000000e+00> : vector<48x8xf32>
    %71 = tpu.matmul %68, %70, %cst_69 {dimension_numbers = #tpu.dot_dimension_numbers<[1], [0], [0], [1], [0, 0, 1, 1], [], []>} : vector<48x12xbf16>, vector<12x8xbf16>, vector<48x8xf32> -> vector<48x8xf32>
    %72 = arith.addf %66, %71 : vector<48x8xf32>
    %c0_70 = arith.constant 0 : index
    %c0_71 = arith.constant 0 : index
    %73 = vector.load %arg6[%c0_70, %c0_71] : memref<1x8xf32, #tpu.memory_space<vmem>>, vector<1x8xf32>
    %74 = vector.broadcast %73 : vector<1x8xf32> to vector<48x8xf32>
    %75 = arith.addf %72, %74 : vector<48x8xf32>
    %cst_72 = arith.constant 0.000000e+00 : f32
    %76 = vector.broadcast %cst_72 : f32 to vector<48x8xf32>
    %77 = arith.maximumf %75, %76 : vector<48x8xf32>
    %78 = arith.truncf %77 : vector<48x8xf32> to vector<48x8xbf16>
    %79 = vector.shape_cast %78 : vector<48x8xbf16> to vector<6x8x8xbf16>
    %c0_73 = arith.constant 0 : index
    %c1_74 = arith.constant 1 : index
    %c0_75 = arith.constant 0 : index
    %80 = vector.load %arg12[%c0_73, %c1_74, %c0_75] : memref<6x10x8xbf16, #tpu.memory_space<vmem>>, vector<6x8x8xbf16>
    tpu.vector_store %arg12[%c0_73, %c1_74, %c0_75], %79 {strides = array<i32>} : memref<6x10x8xbf16, #tpu.memory_space<vmem>>, vector<6x8x8xbf16>,
    %c0_i32_76 = arith.constant 0 : i32
    %81 = arith.cmpi eq, %arg1, %c0_i32_76 : i32
    %82 = arith.extui %81 : i1 to i32
    %c0_i32_77 = arith.constant 0 : i32
    %83 = arith.cmpi ne, %82, %c0_i32_77 : i32
    scf.if %83 {
      %cst_125 = arith.constant 0.000000e+00 : bf16
      %119 = vector.broadcast %cst_125 : bf16 to vector<1x10x8xbf16>
      %c0_126 = arith.constant 0 : index
      %c0_127 = arith.constant 0 : index
      %c0_128 = arith.constant 0 : index
      %120 = vector.load %arg12[%c0_126, %c0_127, %c0_128] : memref<6x10x8xbf16, #tpu.memory_space<vmem>>, vector<1x10x8xbf16>
      tpu.vector_store %arg12[%c0_126, %c0_127, %c0_128], %119 {strides = array<i32>} : memref<6x10x8xbf16, #tpu.memory_space<vmem>>, vector<1x10x8xbf16>,
    } else {
    }
    %c1_i32_78 = arith.constant 1 : i32
    %84 = arith.cmpi eq, %arg1, %c1_i32_78 : i32
    %85 = arith.extui %84 : i1 to i32
    %c0_i32_79 = arith.constant 0 : i32
    %86 = arith.cmpi ne, %85, %c0_i32_79 : i32
    scf.if %86 {
      %cst_125 = arith.constant 0.000000e+00 : bf16
      %119 = vector.broadcast %cst_125 : bf16 to vector<1x10x8xbf16>
      %c5 = arith.constant 5 : index
      %c0_126 = arith.constant 0 : index
      %c0_127 = arith.constant 0 : index
      %120 = vector.load %arg12[%c5, %c0_126, %c0_127] : memref<6x10x8xbf16, #tpu.memory_space<vmem>>, vector<1x10x8xbf16>
      tpu.vector_store %arg12[%c5, %c0_126, %c0_127], %119 {strides = array<i32>} : memref<6x10x8xbf16, #tpu.memory_space<vmem>>, vector<1x10x8xbf16>,
    } else {
    }
    %c0_80 = arith.constant 0 : index
    %c0_81 = arith.constant 0 : index
    %c0_82 = arith.constant 0 : index
    %87 = vector.load %arg12[%c0_80, %c0_81, %c0_82] : memref<6x10x8xbf16, #tpu.memory_space<vmem>>, vector<6x8x8xbf16>
    %c0_83 = arith.constant 0 : index
    %c0_84 = arith.constant 0 : index
    %c0_85 = arith.constant 0 : index
    %88 = vector.load %arg13[%c0_83, %c0_84, %c0_85] : memref<6x8x24xbf16, #tpu.memory_space<vmem>>, vector<6x8x8xbf16>
    tpu.vector_store %arg13[%c0_83, %c0_84, %c0_85], %87 {strides = array<i32>} : memref<6x8x24xbf16, #tpu.memory_space<vmem>>, vector<6x8x8xbf16>,
    %c0_86 = arith.constant 0 : index
    %c1_87 = arith.constant 1 : index
    %c0_88 = arith.constant 0 : index
    %89 = vector.load %arg12[%c0_86, %c1_87, %c0_88] : memref<6x10x8xbf16, #tpu.memory_space<vmem>>, vector<6x8x8xbf16>
    %c0_89 = arith.constant 0 : index
    %c0_90 = arith.constant 0 : index
    %c8_91 = arith.constant 8 : index
    %90 = vector.load %arg13[%c0_89, %c0_90, %c8_91] : memref<6x8x24xbf16, #tpu.memory_space<vmem>>, vector<6x8x8xbf16>
    tpu.vector_store %arg13[%c0_89, %c0_90, %c8_91], %89 {strides = array<i32>} : memref<6x8x24xbf16, #tpu.memory_space<vmem>>, vector<6x8x8xbf16>,
    %c0_92 = arith.constant 0 : index
    %c2_93 = arith.constant 2 : index
    %c0_94 = arith.constant 0 : index
    %91 = vector.load %arg12[%c0_92, %c2_93, %c0_94] : memref<6x10x8xbf16, #tpu.memory_space<vmem>>, vector<6x8x8xbf16>
    %c0_95 = arith.constant 0 : index
    %c0_96 = arith.constant 0 : index
    %c16 = arith.constant 16 : index
    %92 = vector.load %arg13[%c0_95, %c0_96, %c16] : memref<6x8x24xbf16, #tpu.memory_space<vmem>>, vector<6x8x8xbf16>
    tpu.vector_store %arg13[%c0_95, %c0_96, %c16], %91 {strides = array<i32>} : memref<6x8x24xbf16, #tpu.memory_space<vmem>>, vector<6x8x8xbf16>,
    %c0_97 = arith.constant 0 : index
    %c0_98 = arith.constant 0 : index
    %c0_99 = arith.constant 0 : index
    %93 = vector.load %arg13[%c0_97, %c0_98, %c0_99] : memref<6x8x24xbf16, #tpu.memory_space<vmem>>, vector<4x8x24xbf16>
    %94 = vector.shape_cast %93 : vector<4x8x24xbf16> to vector<32x24xbf16>
    %c0_100 = arith.constant 0 : index
    %c0_101 = arith.constant 0 : index
    %c0_102 = arith.constant 0 : index
    %95 = vector.load %arg7[%c0_100, %c0_101, %c0_102] : memref<3x24x8xbf16, #tpu.memory_space<vmem>>, vector<1x24x8xbf16>
    %96 = vector.shape_cast %95 : vector<1x24x8xbf16> to vector<24x8xbf16>
    %cst_103 = arith.constant dense<0.000000e+00> : vector<32x8xf32>
    %97 = tpu.matmul %94, %96, %cst_103 {dimension_numbers = #tpu.dot_dimension_numbers<[1], [0], [0], [1], [0, 0, 1, 1], [], []>} : vector<32x24xbf16>, vector<24x8xbf16>, vector<32x8xf32> -> vector<32x8xf32>
    %c1_104 = arith.constant 1 : index
    %c0_105 = arith.constant 0 : index
    %c0_106 = arith.constant 0 : index
    %98 = vector.load %arg13[%c1_104, %c0_105, %c0_106] : memref<6x8x24xbf16, #tpu.memory_space<vmem>>, vector<4x8x24xbf16>
    %99 = vector.shape_cast %98 : vector<4x8x24xbf16> to vector<32x24xbf16>
    %c1_107 = arith.constant 1 : index
    %c0_108 = arith.constant 0 : index
    %c0_109 = arith.constant 0 : index
    %100 = vector.load %arg7[%c1_107, %c0_108, %c0_109] : memref<3x24x8xbf16, #tpu.memory_space<vmem>>, vector<1x24x8xbf16>
    %101 = vector.shape_cast %100 : vector<1x24x8xbf16> to vector<24x8xbf16>
    %cst_110 = arith.constant dense<0.000000e+00> : vector<32x8xf32>
    %102 = tpu.matmul %99, %101, %cst_110 {dimension_numbers = #tpu.dot_dimension_numbers<[1], [0], [0], [1], [0, 0, 1, 1], [], []>} : vector<32x24xbf16>, vector<24x8xbf16>, vector<32x8xf32> -> vector<32x8xf32>
    %103 = arith.addf %97, %102 : vector<32x8xf32>
    %c2_111 = arith.constant 2 : index
    %c0_112 = arith.constant 0 : index
    %c0_113 = arith.constant 0 : index
    %104 = vector.load %arg13[%c2_111, %c0_112, %c0_113] : memref<6x8x24xbf16, #tpu.memory_space<vmem>>, vector<4x8x24xbf16>
    %105 = vector.shape_cast %104 : vector<4x8x24xbf16> to vector<32x24xbf16>
    %c2_114 = arith.constant 2 : index
    %c0_115 = arith.constant 0 : index
    %c0_116 = arith.constant 0 : index
    %106 = vector.load %arg7[%c2_114, %c0_115, %c0_116] : memref<3x24x8xbf16, #tpu.memory_space<vmem>>, vector<1x24x8xbf16>
    %107 = vector.shape_cast %106 : vector<1x24x8xbf16> to vector<24x8xbf16>
    %cst_117 = arith.constant dense<0.000000e+00> : vector<32x8xf32>
    %108 = tpu.matmul %105, %107, %cst_117 {dimension_numbers = #tpu.dot_dimension_numbers<[1], [0], [0], [1], [0, 0, 1, 1], [], []>} : vector<32x24xbf16>, vector<24x8xbf16>, vector<32x8xf32> -> vector<32x8xf32>
    %109 = arith.addf %103, %108 : vector<32x8xf32>
    %c0_118 = arith.constant 0 : index
    %c0_119 = arith.constant 0 : index
    %110 = vector.load %arg8[%c0_118, %c0_119] : memref<1x8xf32, #tpu.memory_space<vmem>>, vector<1x8xf32>
    %111 = vector.broadcast %110 : vector<1x8xf32> to vector<32x8xf32>
    %112 = arith.addf %109, %111 : vector<32x8xf32>
    %cst_120 = arith.constant 0.000000e+00 : f32
    %113 = vector.broadcast %cst_120 : f32 to vector<32x8xf32>
    %114 = arith.maximumf %112, %113 : vector<32x8xf32>
    %115 = vector.shape_cast %114 : vector<32x8xf32> to vector<4x8x8xf32>
    %c0_121 = arith.constant 0 : index
    %c0_122 = arith.constant 0 : index
    %c0_123 = arith.constant 0 : index
    %c0_124 = arith.constant 0 : index
    %116 = vector.load %arg9[%c0_121, %c0_122, %c0_123, %c0_124] : memref<1x4x8x8xf32, #tpu.memory_space<vmem>>, vector<1x4x8x8xf32>
    %117 = vector.shape_cast %116 : vector<1x4x8x8xf32> to vector<4x8x8xf32>
    %118 = vector.shape_cast %115 : vector<4x8x8xf32> to vector<1x4x8x8xf32>
    tpu.vector_store %arg9[%c0_121, %c0_122, %c0_123, %c0_124], %118 {strides = array<i32>} : memref<1x4x8x8xf32, #tpu.memory_space<vmem>>, vector<1x4x8x8xf32>,
    return
  }
  func.func @transform_0(%arg0: i32, %arg1: i32) -> (i32, i32, i32, i32) {
    %c0_i32 = arith.constant 0 : i32
    %c0_i32_0 = arith.constant 0 : i32
    %c0_i32_1 = arith.constant 0 : i32
    return %arg0, %arg1, %c0_i32, %c0_i32_0 : i32, i32, i32, i32
  }
  func.func @transform_1(%arg0: i32, %arg1: i32) -> (i32, i32, i32, i32) {
    %c2_i32 = arith.constant 2 : i32
    %0 = arith.muli %arg1, %c2_i32 : i32
    %c1_i32 = arith.constant 1 : i32
    %1 = arith.subi %0, %c1_i32 : i32
    %c0_i32 = arith.constant 0 : i32
    %2 = arith.maxsi %1, %c0_i32 : i32
    %c0_i32_0 = arith.constant 0 : i32
    %c0_i32_1 = arith.constant 0 : i32
    %c0_i32_2 = arith.constant 0 : i32
    return %arg0, %2, %c0_i32_0, %c0_i32_1 : i32, i32, i32, i32
  }
  func.func @transform_2(%arg0: i32, %arg1: i32) -> (i32, i32, i32, i32) {
    %c1_i32 = arith.constant 1 : i32
    %0 = arith.addi %arg1, %c1_i32 : i32
    %c2_i32 = arith.constant 2 : i32
    %1 = arith.muli %0, %c2_i32 : i32
    %c3_i32 = arith.constant 3 : i32
    %2 = arith.minsi %1, %c3_i32 : i32
    %c0_i32 = arith.constant 0 : i32
    %c0_i32_0 = arith.constant 0 : i32
    %c0_i32_1 = arith.constant 0 : i32
    return %arg0, %2, %c0_i32, %c0_i32_0 : i32, i32, i32, i32
  }
  func.func @transform_3(%arg0: i32, %arg1: i32) -> (i32, i32, i32) {
    %c0_i32 = arith.constant 0 : i32
    %c0_i32_0 = arith.constant 0 : i32
    %c0_i32_1 = arith.constant 0 : i32
    %c0_i32_2 = arith.constant 0 : i32
    return %c0_i32, %c0_i32_0, %c0_i32_1 : i32, i32, i32
  }
  func.func @transform_4(%arg0: i32, %arg1: i32) -> (i32, i32) {
    %c0_i32 = arith.constant 0 : i32
    %c0_i32_0 = arith.constant 0 : i32
    %c0_i32_1 = arith.constant 0 : i32
    return %c0_i32, %c0_i32_0 : i32, i32
  }
  func.func @transform_5(%arg0: i32, %arg1: i32) -> (i32, i32, i32) {
    %c0_i32 = arith.constant 0 : i32
    %c0_i32_0 = arith.constant 0 : i32
    %c0_i32_1 = arith.constant 0 : i32
    %c0_i32_2 = arith.constant 0 : i32
    return %c0_i32, %c0_i32_0, %c0_i32_1 : i32, i32, i32
  }
  func.func @transform_6(%arg0: i32, %arg1: i32) -> (i32, i32) {
    %c0_i32 = arith.constant 0 : i32
    %c0_i32_0 = arith.constant 0 : i32
    %c0_i32_1 = arith.constant 0 : i32
    return %c0_i32, %c0_i32_0 : i32, i32
  }
  func.func @transform_7(%arg0: i32, %arg1: i32) -> (i32, i32, i32, i32) {
    %c0_i32 = arith.constant 0 : i32
    %c0_i32_0 = arith.constant 0 : i32
    %c0_i32_1 = arith.constant 0 : i32
    return %arg0, %arg1, %c0_i32, %c0_i32_0 : i32, i32, i32, i32
  }
}

</mosaic_0001>

<bundles_post_ra>
// kernel: down_layer_forward.1
= control target key start
LH: loop header
LB: loop body
LE: loop exit
PB: predicated region body
PF: predicated region fallthrough
CT: control target
= control target key end

     0   :  { %s2512_s24 = smov 0   ;;  %s2514_s25 = smov 0   ;;  %s3101_s0 = inlined_call_operand.vmem [shape: bf16[2,16,8,8], index: 0, kind: input, shape index: {}, may-alias: {0,1,2}]   ;;  %s3102_s1 = inlined_call_operand.vmem [shape: bf16[2,16,8,8], index: 1, kind: input, shape index: {}, may-alias: {0,1,2}]   ;;  %s3103_s2 = inlined_call_operand.vmem [shape: bf16[2,16,8,8], index: 2, kind: input, shape index: {}, may-alias: {0,1,2}]   ;;  %s3104_s3 = inlined_call_operand.vmem [shape: bf16[3,12,8], index: 3, kind: input, shape index: {}]   ;;  %s3105_s4 = inlined_call_operand.vmem [shape: f32[1,8], index: 4, kind: input, shape index: {}]   ;;  %s3106_s5 = inlined_call_operand.vmem [shape: bf16[3,24,8], index: 5, kind: input, shape index: {}]   ;;  %s3107_s6 = inlined_call_operand.vmem [shape: f32[1,8], index: 6, kind: input, shape index: {}]   ;;  %s3108_s7 = inlined_call_operand.vmem [shape: f32[2,8,8,8], index: 7, kind: output, shape index: {}]  }
   0x1   :  { %s2516_s26 = smov 0   ;;  %s2518_s27 = smov 0  }
   0x2   :  { %s2520_s28 = smov 0  }
   0x3 LB: > { %s26_s29 = sadd.s32 1, %s2454_s26  ;;  %s29_s30 = sadd.s32 1, %s2458_s27  ;;  %s2462_s28 = sphi %s2520_s28, %s17_s28   ;;  %s2458_s27 = sphi %s2518_s27, %s3132_s27   ;;  %s2454_s26 = sphi %s2516_s26, %s3131_s26   ;;  %s2450_s25 = sphi %s2514_s25, %s3130_s25   ;;  %s2446_s24 = sphi %s2512_s24, %s3129_s24  }
   0x4   : > { %p27_p0 = scmp.ge.s32.totalorder %s26_s29, 2  ;;  %p2148_p1 = scmp.ge.s32.totalorder %s2462_s28, 1 }
   0x5   : > { %p324_p2 = scmp.lt.s32.totalorder %s2462_s28, 5 }
   0x6   : > { %s3134_s29 = smov (%p27_p0, %s26_s29), 0  ;;  %s3136_s30 = smov (!%p27_p0, %s29_s30), %s2458_s27 }
   0x7   : > { %p325_p3 = pnand %p2148_p1, %p324_p2  ;;  %p31_p4 = scmp.ge.s32.totalorder %s3136_s30, 2 }
   0x8   : > { %s2149_s8 = sshll.u32 (!%p325_p3), %s2446_s24, 3  ;;  %p391_p5 = scmp.lt.s32.totalorder (!%p325_p3), %s2450_s25, 1  ;;  %vm447_vm0 = vcmask (!%p325_p3), 24576   ;;  %vm448_vm1 = vsmask.f32 (!%p325_p3), 256  ;;  %vm684_vm5 = vcmask (!%p325_p3), 27648  }
   0x9   : > { %s3138_s30 = smov (%p31_p4, %s3136_s30), 0  ;;  %328 = sbr.rel (%p325_p3) target bundleno = 980 (0x3d4), region = 48 }
   0xa   : > { %p393_p6 = scmp.lt.s32.totalorder (!%p325_p3), %s2149_s8, 15  ;;  %s2161_s9 = sshll.u32 (!%p325_p3), %s2446_s24, 2  ;;  %vm2547_vm2 = vmand (!%p325_p3), %vm447_vm0, %vm448_vm1  ;;  %v456_v1 = vld [vmem:[#allocation2 + $0x10] sm:$0x1] (!%p325_p3)  ;;  %vm474_vm3 = vsmask.f32 (!%p325_p3), 7938 }
   0xb   : > { %v457_v2 = vsel (!%p325_p3), %vm2547_vm2, 0, %v456_v1  ;;  %vm2554_vm4 = vmand (!%p325_p3), %vm447_vm0, %vm474_vm3  ;;  %v482_v4 = vld [vmem:[#allocation2 + $0x14] sm:$0x1] (!%p325_p3)  ;;  %p439_p7 = scmp.lt.s32.totalorder (!%p325_p3), %s2161_s9, 7  ;;  %s2152_s17 = sshll.u32 (!%p325_p3), %s2446_s24, 1  ;;  %vm1000_vm8 = vcmask (!%p325_p3), 1042432  }
   0xc   : > { %458 = vst [vmem:[#allocation2 + $0x10] sm:$0x1] (!%p325_p3), %v457_v2  ;;  %v483_v5 = vsel (!%p325_p3), %vm2554_vm4, 0, %v482_v4  ;;  %s2464_s18 = smov (!%p325_p3), 124   ;;  %s2153_s19 = sadd.s32 (!%p325_p3), 4294967295, %s2152_s17  ;;  %vm2699_vm6 = vmand (!%p325_p3), %vm684_vm5, %vm474_vm3  ;;  %vm1001_vm11 = vcmask (!%p325_p3), 1046532  }
   0xd   : > { %484 = vst [vmem:[#allocation2 + $0x14] sm:$0x1] (!%p325_p3), %v483_v5  ;;  %s2244_s20 = sadd.s32 (!%p325_p3), 2, %s2152_s17  ;;  %p402_p8 = scmp.gt.s32.totalorder (!%p325_p3), %s2153_s19, 0  ;;  %v453_v8 = vld [vmem:[#allocation2 + $0x8] sm:$0x1] (!%p325_p3)  ;;  %vm2753_vm14 = vmor (!%p325_p3), %vm1000_vm8, %vm1001_vm11 }
   0xe   : > { %p420_p9 = scmp.lt.s32.totalorder (!%p325_p3), %s2244_s20, 3  ;;  %v454_v9 = vsel (!%p325_p3), %vm2547_vm2, 0, %v453_v8  ;;  %v479_v10 = vld [vmem:[#allocation2 + $0xc] sm:$0x1] (!%p325_p3)  ;;  %v459_v14 = vld [vmem:[#allocation2 + $0x18] sm:$0x1] (!%p325_p3) }
   0xf   : > { %455 = vst [vmem:[#allocation2 + $0x8] sm:$0x1] (!%p325_p3), %v454_v9  ;;  %v480_v12 = vsel (!%p325_p3), %vm2554_vm4, 0, %v479_v10  ;;  %v485_v15 = vld [vmem:[#allocation2 + $0x1c] sm:$0x1] (!%p325_p3)  ;;  %v460_v16 = vsel (!%p325_p3), %vm2547_vm2, 0, %v459_v14 }
  0x10   : > { %s3140_s25 = smov (!%p391_p5, %s2450_s25), 1  ;;  %s3142_s8 = smov (!%p393_p6, %s2149_s8), 15  ;;  %481 = vst [vmem:[#allocation2 + $0xc] sm:$0x1] %v480_v12  ;;  %v486_v17 = vsel %vm2554_vm4, 0, %v485_v15  ;;  %vm1116_vm15 = vcmask 1045504  }
  0x11   : > { %s2560_s10 = sshll.u32 %s3140_s25, 4  ;;  %s2162_s12 = sshll.u32 %s3140_s25, 3  ;;  %461 = vst [vmem:[#allocation2 + $0x18] sm:$0x1] %v460_v16  ;;  %487 = vst [vmem:[#allocation2 + $0x1c] sm:$0x1] %v486_v17 }
  0x12   : > { %s396_s11 = sadd.s32 %s2560_s10, %s3142_s8  ;;  %s3144_s9 = smov (!%p439_p7, %s2161_s9), 7  ;;  %v462_v22 = vld [vmem:[#allocation2 + $0x20] sm:$0x1]  ;;  %v488_v23 = vld [vmem:[#allocation2 + $0x24] sm:$0x1]  ;;  %vm2468_vm0 = vmmov 0  }
  0x13   : > { %s2151_s13 = sshll.u32 %s396_s11, 2  ;;  %s442_s21 = sadd.s32 %s2162_s12, %s3144_s9  ;;  %v463_v24 = vsel %vm2547_vm2, 0, %v462_v22  ;;  %v489_v25 = vsel %vm2554_vm4, 0, %v488_v23  ;;  %v468_v27 = vld [vmem:[#allocation2 + $0x30] sm:$0x1] }
  0x14   : > { %s2566_s16 = scalar_lea.vmem %s3101_s0, %s2151_s13  ;;  %s2163_s22 = sshll.u32 %s442_s21, 3  ;;  %464 = vst [vmem:[#allocation2 + $0x20] sm:$0x1] %v463_v24  ;;  %490 = vst [vmem:[#allocation2 + $0x24] sm:$0x1] %v489_v25  ;;  %v469_v30 = vsel %vm2547_vm2, 0, %v468_v27 }
  0x15   : > { %v2570_v6 = vld [vmem:[%s2566_s16] sm:$0xf]  ;;  %v2575_v7 = vld [vmem:[%s2566_s16 + $0x4] sm:$0xf]  ;;  %s2580_s8 = scalar_lea.vmem %s3108_s7, %s2163_s22  ;;  %s3146_s19 = smov (!%p402_p8, %s2153_s19), 0 }
  0x16   : > { %555 = vrot.lane.b32.xlu1 %v2570_v6, %s2464_s18  ;;  %v2587_v11 = vld [vmem:[%s2566_s16 + $0xc] sm:$0xf]  ;;  %s3148_s20 = smov (!%p420_p9, %s2244_s20), 3  ;;  %s2154_s9 = sshll.u32 %s3146_s19, 2  ;;  %v2594_v13 = vld [vmem:[%s2566_s16 + $0x14] sm:$0xf] }
  0x17   : > { %p407_p10 = scmp.lt.s32.totalorder %s2154_s9, 15  ;;  %s2158_s11 = sshll.u32 %s3148_s20, 2  ;;  %v2628_v21 = vld [vmem:[%s2566_s16 + $0x1c] sm:$0xf]  ;;  %v2637_v26 = vld [vmem:[%s2566_s16 + $0x8] sm:$0xf] }
  0x18   : > { %p425_p11 = scmp.lt.s32.totalorder %s2158_s11, 15  ;;  %v494_v28 = vld [vmem:[#allocation2 + $0x34] sm:$0x1]  ;;  %470 = vst [vmem:[#allocation2 + $0x30] sm:$0x1] %v469_v30  ;;  %p710_p12 = scmp.gt.s32.totalorder %s2446_s24, 0 }
  0x19   : > { %s3150_s9 = smov (!%p407_p10, %s2154_s9), 15  ;;  %v495_v31 = vsel %vm2554_vm4, 0, %v494_v28  ;;  %v465_v32 = vld [vmem:[#allocation2 + $0x28] sm:$0x1]  ;;  %v491_v33 = vld [vmem:[#allocation2 + $0x2c] sm:$0x1] }
  0x1a   : > { %557 = vrot.lane.b32.xlu1 %v2575_v7, %s2464_s18  ;;  %s3152_s11 = smov (!%p425_p11, %s2158_s11), 15  ;;  %s410_s12 = sadd.s32 %s2560_s10, %s3150_s9  ;;  %496 = vst [vmem:[#allocation2 + $0x34] sm:$0x1] %v495_v31  ;;  %v2651_v34 = vld [vmem:[%s2566_s16 + $0x10] sm:$0xf]  ;;  %v466_v35 = vsel %vm2547_vm2, 0, %v465_v32 }
  0x1b   : > { %s2156_s13 = sshll.u32 %s410_s12, 2  ;;  %s428_s14 = sadd.s32 %s2560_s10, %s3152_s11  ;;  %v492_v36 = vsel %vm2554_vm4, 0, %v491_v33  ;;  %467 = vst [vmem:[#allocation2 + $0x28] sm:$0x1] %v466_v35  ;;  %v450_v39 = vld [vmem:[#allocation2] sm:$0x1] }
  0x1c   : > { %s2607_s19 = scalar_lea.vmem %s3102_s1, %s2156_s13  ;;  %s2160_s20 = sshll.u32 %s428_s14, 2  ;;  %493 = vst [vmem:[#allocation2 + $0x2c] sm:$0x1] %v492_v36  ;;  %v451_v40 = vsel %vm2547_vm2, 0, %v450_v39  ;;  %v476_v41 = vld [vmem:[#allocation2 + $0x4] sm:$0x1] }
  0x1d   : > { %v2610_v18 = vld [vmem:[%s2607_s19 + $0x8] sm:$0xf]  ;;  %s2615_s23 = scalar_lea.vmem %s3103_s2, %s2160_s20  ;;  %v2623_v20 = vld [vmem:[%s2607_s19 + $0xc] sm:$0xf]  ;;  %v2642_v29 = vld [vmem:[%s2607_s19 + $0x4] sm:$0xf] }
  0x1e   : > { %561 = vrot.lane.b32.xlu1 %v2587_v11, %s2464_s18  ;;  %603 = vrot.lane.b32.xlu0 %v2610_v18, %s2464_s18  ;;  %v2620_v19 = vld [vmem:[%s2615_s23 + $0x4] sm:$0xf]  ;;  %v2660_v37 = vld [vmem:[%s2615_s23 + $0xc] sm:$0xf]  ;;  %452 = vst [vmem:[#allocation2] sm:$0x1] %v451_v40 }
  0x1f   : > { %v2665_v38 = vld [vmem:[%s2615_s23] sm:$0xf]  ;;  %v2674_v42 = vld [vmem:[%s2566_s16 + $0x18] sm:$0xf]  ;;  %v477_v43 = vsel %vm2554_vm4, 0, %v476_v41  ;;  %p748_p13 = scmp.lt.s32.totalorder %s2446_s24, 1 }
  0x20   : > { %478 = vst [vmem:[#allocation2 + $0x4] sm:$0x1] %v477_v43  ;;  %v2681_v44 = vld [vmem:[%s2607_s19] sm:$0xf]  ;;  %v471_v45 = vld [vmem:[#allocation2 + $0x38] sm:$0x1] }
  0x21   : > { %v472_v46 = vsel %vm2547_vm2, 0, %v471_v45  ;;  %v497_v47 = vld [vmem:[#allocation2 + $0x3c] sm:$0x1]  ;;  %v2690_v49 = vld [vmem:[%s2615_s23 + $0x8] sm:$0xf]  ;;  %s2466_s25 = smov 8  }
  0x22   : > { %565 = vrot.lane.b32.xlu1 %v2594_v13, %s2464_s18  ;;  %605 = vrot.lane.b32.xlu0 %v2623_v20, %s2464_s18  ;;  %473 = vst [vmem:[#allocation2 + $0x38] sm:$0x1] %v472_v46  ;;  %v498_v48 = vsel %vm2554_vm4, 0, %v497_v47  ;;  %v686_v60 = vld [vmem:[#allocation2 + $0x10] sm:$0xf]  ;;  %vm1059_vm4 = vcmask 93248  }
  0x23   : > { %499 = vst [vmem:[#allocation2 + $0x3c] sm:$0x1] %v498_v48  ;;  %v689_v61 = vld [vmem:[#allocation2 + $0x14] sm:$0x1]  ;;  %s711_s10 = scalar_select %p710_p12, 1, 0 }
  0x24   : > { %s2723_s16 = scalar_select %p748_p13, 1, 0  ;;  %vm820_vm9 = vsmask.f32 3328  ;;  %vm821_vm10 = vsmask.f32 7440 }
  0x25   : > { %v712_v5 = vstv %s711_s10  ;;  %v745_v36 = vld [vmem:[#allocation2 + $0xc] sm:$0x1]  ;;  %vm2728_vm12 = vmor %vm820_vm9, %vm821_vm10  ;;  %p2204_p0 = scmp.ne.s32.totalorder %s2446_s24, 0 }
  0x26   : > { %627 = vrot.lane.b32.xlu1 %v2620_v19, %s2464_s18  ;;  %559 = vrot.lane.b32.xlu0 %v2637_v26, %s2464_s18  ;;  %vm2709_vm7 = vcmp.eq.s32.totalorder %v712_v5, 1 }
  0x2a   : > { %569 = vrot.lane.b32.xlu1 %v2628_v21, %s2464_s18  ;;  %563 = vrot.lane.b32.xlu0 %v2651_v34, %s2464_s18 }
  0x2e   : > { %601 = vrot.lane.b32.xlu1 %v2642_v29, %s2464_s18  ;;  %625 = vrot.lane.b32.xlu0 %v2665_v38, %s2464_s18 }
  0x32   : > { %631 = vrot.lane.b32.xlu1 %v2660_v37, %s2464_s18  ;;  %567 = vrot.lane.b32.xlu0 %v2674_v42, %s2464_s18 }
  0x36   : > { %599 = vrot.lane.b32.xlu0 %v2681_v44, %s2464_s18 }
  0x3a   : > { %629 = vrot.lane.b32.xlu0 %v2690_v49, %s2464_s18  ;;  %s2465_s18 = smov 4  }
  0x88   : > { %v556_v50 = vpop.permute.xlu1 %555 }
  0x89   : > { %v579_v51 = vmax.bf16 %v556_v50, %v2570_v6 }
  0x8c   : > { %v558_v52 = vpop.permute.xlu1 %557 }
  0x8d   : > { %v580_v53 = vmax.bf16 %v558_v52, %v2575_v7 }
  0x8f   : > { %v587_v54 = vmax.bf16 %v580_v53, %v579_v51 }
  0x90   : > { %v562_v57 = vpop.permute.xlu1 %561  ;;  %v604_v3 = vpop.permute.xlu0 %603 }
  0x91   : > { %v644_v55 = vshrl.u32 %v587_v54, 16  ;;  %v647_v56 = vshll.u32 %v587_v54, 16  ;;  %v613_v7 = vmax.bf16 %v604_v3, %v2610_v18  ;;  %v582_v12 = vmax.bf16 %v562_v57, %v2587_v11  ;;  %v695_v57 = vld [vmem:[#allocation2 + $0x1c] sm:$0x1] }
  0x93   : > { %v646_v58 = vrot.slane %v644_v55, 7 }
  0x94   : > { %v566_v4 = vpop.permute.xlu1 %565  ;;  %v606_v6 = vpop.permute.xlu0 %605 }
  0x95   : > { %v649_v62 = vor.u32 %v647_v56, %v646_v58  ;;  %v650_v63 = vrot.slane %v646_v58, 4  ;;  %v614_v8 = vmax.bf16 %v606_v6, %v2623_v20  ;;  %v584_v11 = vmax.bf16 %v566_v4, %v2594_v13  ;;  %v692_v56 = vld [vmem:[#allocation2 + $0x18] sm:$0xf] }
  0x97   : > { %v687_v1 = vsel %vm2699_vm6, %v649_v62, %v686_v60  ;;  %v690_v2 = vsel %vm2547_vm2, %v650_v63, %v689_v61  ;;  %v616_v10 = vmax.bf16 %v614_v8, %v613_v7  ;;  %v750_v60 = vstv %s2723_s16 }
  0x98   : > { %688 = vst [vmem:[#allocation2 + $0x10] sm:$0xf] %v687_v1  ;;  %691 = vst [vmem:[#allocation2 + $0x14] sm:$0x1] %v690_v2  ;;  %v2715_v14 = vpop.permute.xlu1 %627  ;;  %v560_v15 = vpop.permute.xlu0 %559  ;;  %vm2746_vm13 = vcmp.eq.s32.totalorder %v750_v60, 1 }
  0x99   : > { %v715_v22 = vsel %vm2709_vm7, %v616_v10, 0  ;;  %v581_v18 = vmax.bf16 %v560_v15, %v2637_v26  ;;  %v742_v26 = vld [vmem:[#allocation2 + $0x8] sm:$0xf]  ;;  %v638_v61 = vmax.bf16 %v2715_v14, %v2620_v19  ;;  %v698_v14 = vld [vmem:[#allocation2 + $0x20] sm:$0xf] }
  0x9a   : > { %v725_v24 = vshrl.u32 %v715_v22, 16  ;;  %v728_v33 = vshll.u32 %v715_v22, 16  ;;  %v701_v15 = vld [vmem:[#allocation2 + $0x24] sm:$0x1] }
  0x9b   : > { %v588_v28 = vmax.bf16 %v582_v12, %v581_v18 }
  0x9c   : > { %v727_v32 = vrot.slane %v725_v24, 7  ;;  %v564_v35 = vpop.permute.xlu0 %563  ;;  %v570_v43 = vpop.permute.xlu1 %569 }
  0x9d   : > { %v652_v39 = vshrl.u32 %v588_v28, 16  ;;  %v655_v40 = vshll.u32 %v588_v28, 16  ;;  %v583_v41 = vmax.bf16 %v564_v35, %v2651_v34  ;;  %v586_v22 = vmax.bf16 %v570_v43, %v2628_v21 }
  0x9e   : > { %v730_v45 = vor.u32 %v728_v33, %v727_v32  ;;  %v731_v46 = vrot.slane %v727_v32, 4  ;;  %v778_v32 = vld [vmem:[#allocation2 + $0x34] sm:$0x1] }
  0x9f   : > { %v808_v16 = vld [vmem:[#allocation2 + $0x10] sm:$0xf]  ;;  %v809_v17 = vld [vmem:[#allocation2 + $0x14] sm:$0x1]  ;;  %v654_v48 = vrot.slane %v652_v39, 7  ;;  %v589_v50 = vmax.bf16 %v584_v11, %v583_v41 }
  0xa0   : > { %v852_v20 = vshrl.u32 %v808_v16, 16  ;;  %v855_v23 = vshll.u32 %v808_v16, 16  ;;  %v861_v25 = vshll.u32 %v809_v17, 16  ;;  %v789_v27 = vld [vmem:[#allocation2 + $0x10] sm:$0xf]  ;;  %v743_v34 = vsel %vm2699_vm6, %v730_v45, %v742_v26  ;;  %v626_v58 = vpop.permute.xlu0 %625  ;;  %v602_v12 = vpop.permute.xlu1 %601 }
  0xa1   : > { %798 = vst.msk [vmem:[#allocation3 + $0x8] sm:$0xf] %vm684_vm5, %v789_v27  ;;  %v972_v53 = vld [vmem:[#allocation2 + $0x10] sm:$0xe]  ;;  %v973_v54 = vld [vmem:[#allocation2 + $0x14] sm:$0x1]  ;;  %v746_v55 = vsel %vm2547_vm2, %v731_v46, %v745_v36  ;;  %v657_v62 = vor.u32 %v655_v40, %v654_v48  ;;  %v637_v3 = vmax.bf16 %v626_v58, %v2665_v38 }
  0xa2   : > { %v854_v30 = vrot.slane %v852_v20, 4  ;;  %v857_v31 = vrot.slane %v855_v23, 5  ;;  %v863_v47 = vrot.slane %v861_v25, 5  ;;  %744 = vst [vmem:[#allocation2 + $0x8] sm:$0xf] %v743_v34  ;;  %v658_v63 = vrot.slane %v654_v48, 4 }
  0xa3   : > { %747 = vst [vmem:[#allocation2 + $0xc] sm:$0x1] %v746_v55  ;;  %v660_v1 = vshrl.u32 %v589_v50, 16  ;;  %v663_v2 = vshll.u32 %v589_v50, 16  ;;  %v2166_v5 = vrot.slane %v972_v53, 9  ;;  %v1013_v6 = vrot.slane %v973_v54, 5 }
  0xa4   : > { %v858_v13 = vor.u32 %v857_v31, %v854_v30  ;;  %v693_v7 = vsel %vm2699_vm6, %v657_v62, %v692_v56  ;;  %v696_v8 = vsel %vm2547_vm2, %v658_v63, %v695_v57  ;;  %v641_v16 = vmax.bf16 %v638_v61, %v637_v3  ;;  %v568_v17 = vpop.permute.xlu0 %567  ;;  %v775_v31 = vld [vmem:[#allocation2 + $0x30] sm:$0xf]  ;;  %v704_v53 = vld [vmem:[#allocation2 + $0x28] sm:$0xf]  ;;  %v707_v63 = vld [vmem:[#allocation2 + $0x2c] sm:$0x1] }
  0xa5   : > { %v662_v19 = vrot.slane %v660_v1, 7  ;;  %694 = vst [vmem:[#allocation2 + $0x18] sm:$0xf] %v693_v7  ;;  %697 = vst [vmem:[#allocation2 + $0x1c] sm:$0x1] %v696_v8  ;;  %v585_v23 = vmax.bf16 %v568_v17, %v2674_v42  ;;  %v612_v25 = vmax.bf16 %v602_v12, %v2642_v29  ;;  %v1014_v27 = vsel %vm2753_vm14, %v2166_v5, %v1013_v6  ;;  %v632_v42 = vpop.permute.xlu1 %631 }
  0xa6   : > { %v859_v52 = vrot.slane %v858_v13, 4  ;;  %v752_v24 = vsel %vm2746_vm13, %v641_v16, 0  ;;  %v640_v46 = vmax.bf16 %v632_v42, %v2660_v37  ;;  %v736_v17 = vld [vmem:[#allocation2] sm:$0xf] }
  0xa7   : > { %v665_v18 = vor.u32 %v663_v2, %v662_v19  ;;  %v666_v20 = vrot.slane %v662_v19, 4  ;;  %v755_v30 = vshrl.u32 %v752_v24, 16  ;;  %v758_v21 = vshll.u32 %v752_v24, 16 }
  0xa8   : > { %v864_v4 = vsel %vm2728_vm12, %v859_v52, %v863_v47  ;;  %v590_v29 = vmax.bf16 %v586_v22, %v585_v23  ;;  %v600_v33 = vpop.permute.xlu0 %599  ;;  %v739_v22 = vld [vmem:[#allocation2 + $0x4] sm:$0x1] }
  0xa9   : > { %939 = vrot.lane.b32.xlu1 %v864_v4, %s2465_s18  ;;  %v699_v28 = vsel %vm2699_vm6, %v665_v18, %v698_v14  ;;  %v702_v11 = vsel %vm2547_vm2, %v666_v20, %v701_v15  ;;  %v806_v35 = vld [vmem:[#allocation2 + $0x8] sm:$0xf]  ;;  %v757_v36 = vrot.slane %v755_v30, 7  ;;  %v611_v39 = vmax.bf16 %v600_v33, %v2681_v44 }
  0xaa   : > { %700 = vst [vmem:[#allocation2 + $0x20] sm:$0xf] %v699_v28  ;;  %703 = vst [vmem:[#allocation2 + $0x24] sm:$0x1] %v702_v11  ;;  %v807_v26 = vld [vmem:[#allocation2 + $0xc] sm:$0x1] }
  0xab   : > { %v838_v40 = vshrl.u32 %v806_v35, 16  ;;  %v841_v41 = vshll.u32 %v806_v35, 16  ;;  %v2770_v43 = vld [vmem:[#allocation2 + $0x8] sm:$0xe]  ;;  %v668_v13 = vshrl.u32 %v590_v29, 16  ;;  %v671_v45 = vshll.u32 %v590_v29, 16 }
  0xac   : > { %v847_v47 = vshll.u32 %v807_v26, 16  ;;  %v788_v48 = vld [vmem:[#allocation2 + $0x8] sm:$0xf]  ;;  %v760_v50 = vor.u32 %v758_v21, %v757_v36  ;;  %v761_v52 = vrot.slane %v757_v36, 4  ;;  %v615_v54 = vmax.bf16 %v612_v25, %v611_v39  ;;  %v971_v55 = vld [vmem:[#allocation2 + $0xc] sm:$0x1]  ;;  %v630_v44 = vpop.permute.xlu0 %629 }
  0xad   : > { %1039 = vrot.lane.b32.xlu1 %v1014_v27, %s2466_s25  ;;  %v840_v34 = vrot.slane %v838_v40, 4  ;;  %797 = vst.msk [vmem:[#allocation3 + $0x4] sm:$0xf] %vm684_vm5, %v788_v48  ;;  %v670_v56 = vrot.slane %v668_v13, 7  ;;  %v843_v57 = vrot.slane %v841_v41, 5  ;;  %v2165_v60 = vrot.slane %v2770_v43, 9 }
  0xae   : > { %v849_v58 = vrot.slane %v847_v47, 5  ;;  %v2775_v61 = vld [vmem:[#allocation2 + $0x18] sm:$0xf]  ;;  %v776_v37 = vsel %vm2699_vm6, %v760_v50, %v775_v31  ;;  %v779_v62 = vsel %vm2547_vm2, %v761_v52, %v778_v32  ;;  %v714_v1 = vsel %vm2709_vm7, %v615_v54, 0  ;;  %v784_v32 = vld [vmem:[#allocation2 + $0x3c] sm:$0x1] }
  0xaf   : > { %v639_v2 = vmax.bf16 %v630_v44, %v2690_v49  ;;  %v790_v3 = vld [vmem:[#allocation2 + $0x18] sm:$0xf]  ;;  %777 = vst [vmem:[#allocation2 + $0x30] sm:$0xf] %v776_v37  ;;  %780 = vst [vmem:[#allocation2 + $0x34] sm:$0x1] %v779_v62  ;;  %v673_v4 = vor.u32 %v671_v45, %v670_v56  ;;  %v844_v19 = vor.u32 %v843_v57, %v840_v34 }
  0xb0   : > { %v674_v5 = vrot.slane %v670_v56, 4  ;;  %v717_v6 = vshrl.u32 %v714_v1, 16  ;;  %v720_v7 = vshll.u32 %v714_v1, 16  ;;  %799 = vst.msk [vmem:[#allocation3 + $0xc] sm:$0xf] %vm684_vm5, %v790_v3  ;;  %v1009_v12 = vrot.slane %v971_v55, 5 }
  0xb1   : > { %v642_v8 = vmax.bf16 %v640_v46, %v639_v2  ;;  %v812_v14 = vld [vmem:[#allocation2 + $0x20] sm:$0xf]  ;;  %v813_v15 = vld [vmem:[#allocation2 + $0x24] sm:$0x1]  ;;  %v866_v16 = vshrl.u32 %v2775_v61, 16  ;;  %v705_v9 = vsel %vm2699_vm6, %v673_v4, %v704_v53  ;;  %v845_v24 = vrot.slane %v844_v19, 4 }
  0xb2   : > { %v708_v49 = vsel %vm2547_vm2, %v674_v5, %v707_v63  ;;  %v719_v18 = vrot.slane %v717_v6, 7  ;;  %v880_v20 = vshrl.u32 %v812_v14, 16  ;;  %706 = vst [vmem:[#allocation2 + $0x28] sm:$0xf] %v705_v9  ;;  %v883_v25 = vshll.u32 %v812_v14, 16 }
  0xb3   : > { %709 = vst [vmem:[#allocation2 + $0x2c] sm:$0x1] %v708_v49  ;;  %v753_v23 = vsel %vm2746_vm13, %v642_v8, 0  ;;  %v889_v27 = vshll.u32 %v813_v15, 16  ;;  %v791_v28 = vld [vmem:[#allocation2 + $0x20] sm:$0xf]  ;;  %v850_v29 = vsel %vm2728_vm12, %v845_v24, %v849_v58  ;;  %v1010_v43 = vsel %vm2753_vm14, %v2165_v60, %v1009_v12 }
  0xb4   : > { %v722_v11 = vor.u32 %v720_v7, %v719_v18  ;;  %v723_v30 = vrot.slane %v719_v18, 4  ;;  %v763_v21 = vshrl.u32 %v753_v23, 16  ;;  %v766_v42 = vshll.u32 %v753_v23, 16  ;;  %800 = vst.msk [vmem:[#allocation3 + $0x10] sm:$0xf] %vm684_vm5, %v791_v28  ;;  %937 = vrot.lane.b32.xlu0 %v850_v29, %s2465_s18 }
  0xb5   : > { %v781_v31 = vld [vmem:[#allocation2 + $0x38] sm:$0xf]  ;;  %v882_v33 = vrot.slane %v880_v20, 4  ;;  %v885_v35 = vrot.slane %v883_v25, 5  ;;  %v811_v26 = vld [vmem:[#allocation2 + $0x1c] sm:$0x1] }
  0xb6   : > { %v737_v10 = vsel %vm2699_vm6, %v722_v11, %v736_v17  ;;  %v740_v36 = vsel %vm2547_vm2, %v723_v30, %v739_v22  ;;  %v765_v39 = vrot.slane %v763_v21, 7  ;;  %v976_v40 = vld [vmem:[#allocation2 + $0x20] sm:$0xe]  ;;  %v977_v41 = vld [vmem:[#allocation2 + $0x24] sm:$0x1]  ;;  %v868_v45 = vrot.slane %v866_v16, 4 }
  0xb7   : > { %738 = vst [vmem:[#allocation2] sm:$0xf] %v737_v10  ;;  %741 = vst [vmem:[#allocation2 + $0x4] sm:$0x1] %v740_v36  ;;  %v886_v13 = vor.u32 %v885_v35, %v882_v33  ;;  %v869_v46 = vshll.u32 %v2775_v61, 16  ;;  %v891_v53 = vrot.slane %v889_v27, 5 }
  0xb8   : > { %v974_v47 = vld [vmem:[#allocation2 + $0x18] sm:$0xe]  ;;  %v816_v48 = vld [vmem:[#allocation2 + $0x30] sm:$0xf]  ;;  %v768_v50 = vor.u32 %v766_v42, %v765_v39  ;;  %v769_v52 = vrot.slane %v765_v39, 4  ;;  %v875_v54 = vshll.u32 %v811_v26, 16  ;;  %1037 = vrot.lane.b32.xlu0 %v1010_v43, %s2466_s25 }
  0xb9   : > { %v975_v34 = vld [vmem:[#allocation2 + $0x1c] sm:$0x1]  ;;  %v887_v55 = vrot.slane %v886_v13, 4  ;;  %v871_v56 = vrot.slane %v869_v46, 5  ;;  %v2168_v44 = vrot.slane %v976_v40, 9  ;;  %v1021_v57 = vrot.slane %v977_v41, 5 }
  0xba   : > { %v817_v58 = vld [vmem:[#allocation2 + $0x34] sm:$0x1]  ;;  %v782_v37 = vsel %vm2699_vm6, %v768_v50, %v781_v31  ;;  %v785_v60 = vsel %vm2547_vm2, %v769_v52, %v784_v32  ;;  %v2167_v61 = vrot.slane %v974_v47, 9  ;;  %v908_v62 = vshrl.u32 %v816_v48, 16  ;;  %v814_v63 = vld [vmem:[#allocation2 + $0x28] sm:$0xf] }
  0xbb   : > { %783 = vst [vmem:[#allocation2 + $0x38] sm:$0xf] %v782_v37  ;;  %786 = vst [vmem:[#allocation2 + $0x3c] sm:$0x1] %v785_v60  ;;  %v892_v1 = vsel %vm2728_vm12, %v887_v55, %v891_v53  ;;  %v872_v2 = vor.u32 %v871_v56, %v868_v45  ;;  %v1017_v3 = vrot.slane %v975_v34, 5  ;;  %v911_v4 = vshll.u32 %v816_v48, 16 }
  0xbc   : > { %v815_v5 = vld [vmem:[#allocation2 + $0x2c] sm:$0x1]  ;;  %943 = vrot.lane.b32.xlu1 %v892_v1, %s2465_s18  ;;  %v910_v59 = vrot.slane %v908_v62, 4  ;;  %v917_v6 = vshll.u32 %v817_v58, 16  ;;  %v894_v0 = vshrl.u32 %v814_v63, 16  ;;  %v897_v7 = vshll.u32 %v814_v63, 16 }
  0xbd   : > { %v873_v8 = vrot.slane %v872_v2, 4  ;;  %v877_v19 = vrot.slane %v875_v54, 5  ;;  %v913_v12 = vrot.slane %v911_v4, 5  ;;  %v980_v14 = vld [vmem:[#allocation2 + $0x30] sm:$0xe]  ;;  %v903_v9 = vshll.u32 %v815_v5, 16 }
  0xbe   : > { %v896_v15 = vrot.slane %v894_v0, 4  ;;  %v899_v16 = vrot.slane %v897_v7, 5  ;;  %v981_v49 = vld [vmem:[#allocation2 + $0x34] sm:$0x1]  ;;  %v1022_v22 = vsel %vm2753_vm14, %v2168_v44, %v1021_v57  ;;  %v2815_v20 = vld [vmem:[#allocation2 + $0x28] sm:$0xe]  ;;  %v1018_v25 = vsel %vm2753_vm14, %v2167_v61, %v1017_v3 }
  0xbf   : > { %v878_v17 = vsel %vm2728_vm12, %v873_v8, %v877_v19  ;;  %v914_v18 = vor.u32 %v913_v12, %v910_v59  ;;  %v2817_v23 = vld [vmem:[#allocation2 + $0x2c] sm:$0x1]  ;;  %v804_v24 = vld [vmem:[#allocation2] sm:$0xf]  ;;  %v919_v27 = vrot.slane %v917_v6, 5  ;;  %v2170_v11 = vrot.slane %v980_v14, 9 }
  0xc0   : > { %941 = vrot.lane.b32.xlu0 %v878_v17, %s2465_s18  ;;  %1043 = vrot.lane.b32.xlu1 %v1022_v22, %s2466_s25  ;;  %v900_v28 = vor.u32 %v899_v16, %v896_v15  ;;  %v968_v30 = vld [vmem:[#allocation2] sm:$0xe]  ;;  %v793_v21 = vld [vmem:[#allocation2 + $0x30] sm:$0xf]  ;;  %v1029_v31 = vrot.slane %v981_v49, 5  ;;  %v824_v32 = vshrl.u32 %v804_v24, 16 }
  0xc1   : > { %v915_v42 = vrot.slane %v914_v18, 4  ;;  %v827_v29 = vshll.u32 %v804_v24, 16  ;;  %v2400_v33 = vld [vmem:[%s3104_s3 + $0x8] sm:$0x3f]   ;;  %802 = vst.msk [vmem:[#allocation3 + $0x18] sm:$0xf] %vm684_vm5, %v793_v21 }
  0xc2   : > { %v792_v35 = vld [vmem:[#allocation2 + $0x28] sm:$0xf]  ;;  %v901_v26 = vrot.slane %v900_v28, 4  ;;  %v905_v10 = vrot.slane %v903_v9, 5  ;;  %v2169_v36 = vrot.slane %v2815_v20, 9  ;;  %v1025_v39 = vrot.slane %v2817_v23, 5 }
  0xc3   : > { %v818_v40 = vld [vmem:[#allocation2 + $0x38] sm:$0xf]  ;;  %801 = vst.msk [vmem:[#allocation3 + $0x14] sm:$0xf] %vm684_vm5, %v792_v35  ;;  %v920_v41 = vsel %vm2728_vm12, %v915_v42, %v919_v27  ;;  %v969_v43 = vld [vmem:[#allocation2 + $0x4] sm:$0x1]  ;;  %v1030_v54 = vsel %vm2753_vm14, %v2170_v11, %v1029_v31 }
  0xc4   : > { %v2164_v13 = vrot.slane %v968_v30, 9  ;;  %v826_v45 = vrot.slane %v824_v32, 4  ;;  %v829_v46 = vrot.slane %v827_v29, 5  ;;  %1041 = vrot.lane.b32.xlu0 %v1018_v25, %s2466_s25  ;;  %947 = vrot.lane.b32.xlu1 %v920_v41, %s2465_s18  ;;  %v805_v47 = vld [vmem:[#allocation2 + $0x4] sm:$0x1]  ;;  %v922_v48 = vshrl.u32 %v818_v40, 16 }
  0xc5   : > { %v925_v50 = vshll.u32 %v818_v40, 16  ;;  %v787_v52 = vld [vmem:[#allocation2] sm:$0xf]  ;;  %v906_v53 = vsel %vm2728_vm12, %v901_v26, %v905_v10  ;;  %v819_v34 = vld [vmem:[#allocation2 + $0x3c] sm:$0x1]  ;;  %v1005_v37 = vrot.slane %v969_v43, 5  ;;  %v1026_v6 = vsel %vm2753_vm14, %v2169_v36, %v1025_v39 }
  0xc6   : > { %v982_v55 = vld [vmem:[#allocation2 + $0x38] sm:$0xe]  ;;  %796 = vst.msk [vmem:[#allocation3] sm:$0xf] %vm684_vm5, %v787_v52  ;;  %v924_v44 = vrot.slane %v922_v48, 4  ;;  %v830_v60 = vor.u32 %v829_v46, %v826_v45  ;;  %v833_v61 = vshll.u32 %v805_v47, 16 }
  0xc7   : > { %v794_v56 = vld [vmem:[#allocation2 + $0x38] sm:$0xf]  ;;  %v927_v57 = vrot.slane %v925_v50, 5  ;;  %v983_v58 = vld [vmem:[#allocation2 + $0x3c] sm:$0x1]  ;;  %v2467_v62 = vmov 0.0   ;;  %v1006_v0 = vsel %vm2753_vm14, %v2164_v13, %v1005_v37 }
  0xc8   : > { %803 = vst.msk [vmem:[#allocation3 + $0x1c] sm:$0xf] %vm684_vm5, %v794_v56  ;;  %2275 = vmatprep.subr.bf16.mxu0 %v2467_v62  ;;  %v1118_v63 = vsel %vm1116_vm15, %v2400_v33, 0  ;;  %2289 = vmatprep.subr.bf16.mxu1 %v2467_v62  ;;  %v2405_v1 = vld [vmem:[%s3104_s3] sm:$0x3f]   ;;  %v931_v3 = vshll.u32 %v819_v34, 16 }
  0xc9   : > { %945 = vrot.lane.b32.xlu0 %v906_v53, %s2465_s18  ;;  %1047 = vrot.lane.b32.xlu1 %v1030_v54, %s2466_s25  ;;  %v928_v2 = vor.u32 %v927_v57, %v924_v44  ;;  %v2171_v4 = vrot.slane %v982_v55, 9  ;;  %v1033_v5 = vrot.slane %v983_v58, 5  ;;  %v1207_v59 = vsel %vm1116_vm15, %v2405_v1, 0  ;;  %v2402_v20 = vld [vmem:[%s3104_s3 + $0x10] sm:$0x3f]  }
  0xca   : > { %2276 = vmatpush3.bf16.msra.mxu0 %v1118_v63  ;;  %2277 = vmatprep.mubr.msk.bf16.mxu0 %vm2468_vm0, %v2467_v62  ;;  %v831_v7 = vrot.slane %v830_v60, 4  ;;  %v835_v8 = vrot.slane %v833_v61, 5  ;;  %v933_v12 = vrot.slane %v931_v3, 5  ;;  %vm959_vm2 = vcmask 60448   ;;  %v502_v13 = vld [vmem:[#allocation4] sm:$0x1] }
  0xcb   : > { %2303 = vmatprep.subr.bf16.mxu0 %v2467_v62  ;;  %2291 = vmatprep.mubr.msk.bf16.mxu1 %vm2468_vm0, %v2467_v62  ;;  %v929_v19 = vrot.slane %v928_v2, 4  ;;  %v1034_v14 = vsel %vm2753_vm14, %v2171_v4, %v1033_v5  ;;  %vm1106_vm5 = vcmask 97280   ;;  %v1306_v27 = vsel %vm1116_vm15, %v2402_v20, 0  ;;  %v521_v45 = vld [vmem:[#allocation4 + $0x4] sm:$0x1] }
  0xcc   : > { %2290 = vmatpush3.bf16.msra.mxu1 %v1207_v59  ;;  %v836_v15 = vsel %vm2728_vm12, %v831_v7, %v835_v8  ;;  %vm500_vm6 = vcmask 57344   ;;  %v505_v52 = vld [vmem:[#allocation4 + $0x8] sm:$0x1]  ;;  %v524_v53 = vld [vmem:[#allocation4 + $0xc] sm:$0x1] }
  0xcd   : > { %1045 = vrot.lane.b32.xlu0 %v1026_v6, %s2466_s25  ;;  %1035 = vrot.lane.b32.xlu1 %v1006_v0, %s2466_s25  ;;  %v934_v16 = vsel %vm2728_vm12, %v929_v19, %v933_v12  ;;  %vm2914_vm7 = vmand %vm500_vm6, %vm448_vm1  ;;  %v508_v55 = vld [vmem:[#allocation4 + $0x10] sm:$0x1]  ;;  %v527_v56 = vld [vmem:[#allocation4 + $0x14] sm:$0x1]  ;;  %vm1468_vm1 = vcmask 60416  }
  0xce   : > { %v503_v47 = vsel %vm2914_vm7, 0, %v502_v13  ;;  %vm2922_vm8 = vmand %vm500_vm6, %vm474_vm3  ;;  %v506_v54 = vsel %vm2914_vm7, 0, %v505_v52  ;;  %v509_v44 = vsel %vm2914_vm7, 0, %v508_v55  ;;  %v511_v58 = vld [vmem:[#allocation4 + $0x18] sm:$0x1] }
  0xcf   : > { %504 = vst [vmem:[#allocation4] sm:$0x1] %v503_v47  ;;  %v522_v50 = vsel %vm2922_vm8, 0, %v521_v45  ;;  %v525_v34 = vsel %vm2922_vm8, 0, %v524_v53  ;;  %507 = vst [vmem:[#allocation4 + $0x8] sm:$0x1] %v506_v54 }
  0xd0   : > { %523 = vst [vmem:[#allocation4 + $0x4] sm:$0x1] %v522_v50  ;;  %526 = vst [vmem:[#allocation4 + $0xc] sm:$0x1] %v525_v34  ;;  %v528_v57 = vsel %vm2922_vm8, 0, %v527_v56  ;;  %v512_v60 = vsel %vm2914_vm7, 0, %v511_v58 }
  0xd1   : > { %935 = vrot.lane.b32.xlu0 %v836_v15, %s2465_s18  ;;  %1049 = vrot.lane.b32.xlu1 %v1034_v14, %s2466_s25  ;;  %510 = vst [vmem:[#allocation4 + $0x10] sm:$0x1] %v509_v44  ;;  %529 = vst [vmem:[#allocation4 + $0x14] sm:$0x1] %v528_v57  ;;  %v530_v37 = vld [vmem:[#allocation4 + $0x1c] sm:$0x1] }
  0xd2   : > { %v531_v61 = vsel %vm2922_vm8, 0, %v530_v37  ;;  %513 = vst [vmem:[#allocation4 + $0x18] sm:$0x1] %v512_v60  ;;  %v533_v1 = vld [vmem:[#allocation4 + $0x24] sm:$0x1]  ;;  %vm2958_vm9 = vmand %vm1468_vm1, %vm474_vm3 }
  0xd3   : > { %532 = vst [vmem:[#allocation4 + $0x1c] sm:$0x1] %v531_v61  ;;  %v534_v2 = vsel %vm2922_vm8, 0, %v533_v1  ;;  %v517_v3 = vld [vmem:[#allocation4 + $0x28] sm:$0x1] }
  0xd4   : > { %535 = vst [vmem:[#allocation4 + $0x24] sm:$0x1] %v534_v2  ;;  %v536_v4 = vld [vmem:[#allocation4 + $0x2c] sm:$0x1]  ;;  %v518_v5 = vsel %vm2914_vm7, 0, %v517_v3 }
  0xd5   : > { %949 = vrot.lane.b32.xlu0 %v934_v16, %s2465_s18  ;;  %v537_v59 = vsel %vm2922_vm8, 0, %v536_v4  ;;  %519 = vst [vmem:[#allocation4 + $0x28] sm:$0x1] %v518_v5 }
  0xd6   : > { %538 = vst [vmem:[#allocation4 + $0x2c] sm:$0x1] %v537_v59  ;;  %v1470_v57 = vld [vmem:[#allocation4] sm:$0xf]  ;;  %v1476_v3 = vld [vmem:[#allocation4 + $0x8] sm:$0xf] }
  0xd7   : > { %v1473_v58 = vld [vmem:[#allocation4 + $0x4] sm:$0x1]  ;;  %v1479_v4 = vld [vmem:[#allocation4 + $0xc] sm:$0x1] }
 0x11b   : > { %v940_v9 = vpop.permute.xlu1 %939 }
 0x11c   : > { %962 = vst.msk [vmem:[#allocation3 + $0x8] sm:$0xf] %vm959_vm2, %v940_v9 }
 0x11f   : > { %v1040_v49 = vpop.permute.xlu1 %1039 }
 0x120   : > { %1062 = vst.msk [vmem:[#allocation3 + $0x8] sm:$0xf] %vm1059_vm4, %v1040_v49 }
 0x126   : > { %v938_v17 = vpop.permute.xlu0 %937 }
 0x127   : > { %961 = vst.msk [vmem:[#allocation3 + $0x4] sm:$0xf] %vm959_vm2, %v938_v17 }
 0x12a   : > { %v1038_v22 = vpop.permute.xlu0 %1037 }
 0x12b   : > { %1061 = vst.msk [vmem:[#allocation3 + $0x4] sm:$0xf] %vm1059_vm4, %v1038_v22 }
 0x12e   : > { %v944_v18 = vpop.permute.xlu1 %943 }
 0x12f   : > { %964 = vst.msk [vmem:[#allocation3 + $0x10] sm:$0xf] %vm959_vm2, %v944_v18 }
 0x132   : > { %v942_v23 = vpop.permute.xlu0 %941  ;;  %v1044_v24 = vpop.permute.xlu1 %1043  ;;  %v2401_v25 = vld [vmem:[#allocation3 + $0x4] sm:$0xff]  }
 0x133   : > { %963 = vst.msk [vmem:[#allocation3 + $0xc] sm:$0xf] %vm959_vm2, %v942_v23  ;;  %2278 = vmatmul.mubr.msk.bf16.vlgmr.msra.gmra.mrb[0].mxu0 %vm1106_vm5, %v2401_v25 }
 0x134   : > { %1064 = vst.msk [vmem:[#allocation3 + $0x10] sm:$0xf] %vm1059_vm4, %v1044_v24  ;;  %2304 = vmatpush3.bf16.msra.mxu0 %v1306_v27  ;;  %2281 = vmatprep.mubr.msk.bf16.mxu0 %vm2468_vm0, %v2467_v62 }
 0x136   : > { %v1042_v28 = vpop.permute.xlu0 %1041  ;;  %v948_v11 = vpop.permute.xlu1 %947 }
 0x137   : > { %1063 = vst.msk [vmem:[#allocation3 + $0xc] sm:$0xf] %vm1059_vm4, %v1042_v28  ;;  %v2951_v28 = vld [vmem:[%s3105_s4] ss:$0 sm:$0xff] }
 0x138   : > { %966 = vst.msk [vmem:[#allocation3 + $0x18] sm:$0xf] %vm959_vm2, %v948_v11 }
 0x13b   : > { %v946_v30 = vpop.permute.xlu0 %945  ;;  %v1048_v21 = vpop.permute.xlu1 %1047 }
 0x13c   : > { %965 = vst.msk [vmem:[#allocation3 + $0x14] sm:$0xf] %vm959_vm2, %v946_v30 }
 0x13d   : > { %1066 = vst.msk [vmem:[#allocation3 + $0x18] sm:$0xf] %vm1059_vm4, %v1048_v21 }
 0x13e   : > { %v2403_v31 = vld [vmem:[#allocation3 + $0xc] sm:$0xff]  }
 0x13f   : > { %v1046_v42 = vpop.permute.xlu0 %1045  ;;  %2282 = vmatmul.mubr.msk.bf16.gmra.mrb[4].mxu0 %vm1106_vm5, %v2403_v31  ;;  %v1036_v32 = vpop.permute.xlu1 %1035  ;;  %v2407_v36 = vld [vmem:[#allocation3 + $0x8] sm:$0xff]  }
 0x140   : > { %1065 = vst.msk [vmem:[#allocation3 + $0x14] sm:$0xf] %vm1059_vm4, %v1046_v42  ;;  %2285 = vmatprep.mubr.msk.bf16.mxu0 %vm2468_vm0, %v2467_v62  ;;  %v2408_v39 = vld [vmem:[#allocation3 + $0x8] sm:$0xff]  }
 0x143   : > { %v936_v29 = vpop.permute.xlu0 %935  ;;  %v1050_v33 = vpop.permute.xlu1 %1049 }
 0x144   : > { %960 = vst.msk [vmem:[#allocation3] sm:$0xf] %vm959_vm2, %v936_v29 }
 0x145   : > { %1060 = vst.msk [vmem:[#allocation3] sm:$0xf] %vm1059_vm4, %v1036_v32 }
 0x147   : > { %v950_v35 = vpop.permute.xlu0 %949  ;;  %v2404_v26 = vld [vmem:[#allocation3 + $0x14] sm:$0xff]  }
 0x148   : > { %967 = vst.msk [vmem:[#allocation3 + $0x1c] sm:$0xf] %vm959_vm2, %v950_v35  ;;  %2286 = vmatmul.mubr.msk.bf16.gmra.mrb[8].mxu0 %vm1106_vm5, %v2404_v26  ;;  %v2409_v40 = vld [vmem:[#allocation3 + $0x10] sm:$0xff]  }
 0x149   : > { %1067 = vst.msk [vmem:[#allocation3 + $0x1c] sm:$0xf] %vm1059_vm4, %v1050_v33  ;;  %2305 = vmatprep.mubr.msk.bf16.mxu0 %vm2468_vm0, %v2467_v62  ;;  %v2410_v41 = vld [vmem:[#allocation3 + $0x10] sm:$0xff]  }
 0x14c   : > { %v2406_v10 = vld [vmem:[#allocation3] sm:$0xff]  }
 0x14d   : > { %2292 = vmatmul.mubr.msk.bf16.vlgmr.msra.gmra.mrb[0].mxu1 %vm1106_vm5, %v2406_v10 }
 0x14e   : > { %2295 = vmatprep.mubr.msk.bf16.mxu1 %vm2468_vm0, %v2467_v62 }
 0x150   : > { %2306 = vmatmul.mubr.msk.bf16.vlgmr.msra.gmra.mrb[12].mxu0 %vm1106_vm5, %v2407_v36  ;;  %v2411_v43 = vld [vmem:[#allocation3 + $0x18] sm:$0xff]  }
 0x151   : > { %2309 = vmatprep.mubr.msk.bf16.mxu0 %vm2468_vm0, %v2467_v62 }
 0x155   : > { %2296 = vmatmul.mubr.msk.bf16.gmra.mrb[4].mxu1 %vm1106_vm5, %v2408_v39 }
 0x156   : > { %2299 = vmatprep.mubr.msk.bf16.mxu1 %vm2468_vm0, %v2467_v62 }
 0x158   : > { %2310 = vmatmul.mubr.msk.bf16.gmra.mrb[16].mxu0 %vm1106_vm5, %v2409_v40 }
 0x159   : > { %2313 = vmatprep.mubr.msk.bf16.mxu0 %vm2468_vm0, %v2467_v62  ;;  %v514_v62 = vld [vmem:[#allocation4 + $0x20] sm:$0x1] }
 0x15a   : > { %v515_v63 = vsel %vm2914_vm7, 0, %v514_v62 }
 0x15b   : > { %516 = vst [vmem:[#allocation4 + $0x20] sm:$0x1] %v515_v63 }
 0x15d   : > { %2300 = vmatmul.mubr.msk.bf16.gmra.mrb[8].mxu1 %vm1106_vm5, %v2410_v41 }
 0x160   : > { %2314 = vmatmul.mubr.msk.bf16.gmra.mrb[20].mxu0 %vm1106_vm5, %v2411_v43 }
 0x206   : > { %v1154_v6 = vpop.f32.mrb[0].mxu0 }
 0x207   : > { %v2279_v0 = vpop.f32.mrb[1].mxu0 }
 0x208   : > { %v1157_v7 = vpop.f32.mrb[2].mxu0 }
 0x209   : > { %v2280_v8 = vpop.f32.mrb[3].mxu0 }
 0x212   : > { %v1162_v19 = vpop.f32.mrb[4].mxu0 }
 0x213   : > { %v2283_v12 = vpop.f32.mrb[5].mxu0 }
 0x214   : > { %v1165_v14 = vpop.f32.mrb[6].mxu0 }
 0x215   : > { %v2284_v15 = vpop.f32.mrb[7].mxu0 }
 0x21b   : > { %v1170_v16 = vpop.f32.mrb[8].mxu0 }
 0x21c   : > { %v2287_v9 = vpop.f32.mrb[9].mxu0 }
 0x21d   : > { %v1173_v49 = vpop.f32.mrb[10].mxu0 }
 0x21e   : > { %v2288_v17 = vpop.f32.mrb[11].mxu0 }
 0x220   : > { %v1243_v22 = vpop.f32.mrb[0].mxu1 }
 0x221   : > { %v1244_v18 = vadd.f32 %v1243_v22, %v1154_v6  ;;  %v2293_v20 = vpop.f32.mrb[1].mxu1 }
 0x222   : > { %v1246_v23 = vpop.f32.mrb[2].mxu1 }
 0x223   : > { %v1247_v24 = vadd.f32 %v1246_v23, %v1157_v7  ;;  %v2294_v25 = vpop.f32.mrb[3].mxu1  ;;  %v1342_v27 = vpop.f32.mrb[12].mxu0 }
 0x224   : > { %v1365_v11 = vadd.f32 %v1342_v27, %v1244_v18  ;;  %v2307_v30 = vpop.f32.mrb[13].mxu0 }
 0x225   : > { %v1345_v21 = vpop.f32.mrb[14].mxu0 }
 0x226   : > { %v1378_v42 = vadd.f32 %v2951_v28, %v1365_v11  ;;  %v1366_v31 = vadd.f32 %v1345_v21, %v1247_v24  ;;  %v2308_v32 = vpop.f32.mrb[15].mxu0 }
 0x227   : > { %v1482_v32 = vld [vmem:[#allocation4 + $0x10] sm:$0xf] }
 0x228   : > { %v1384_v29 = vmax.f32 %v1378_v42, 0.0  ;;  %v1379_v33 = vadd.f32 %v2951_v28, %v1366_v31  ;;  %v1251_v35 = vpop.f32.mrb[4].mxu1 }
 0x229   : > { %v1252_v26 = vadd.f32 %v1251_v35, %v1162_v19  ;;  %v2297_v10 = vpop.f32.mrb[5].mxu1 }
 0x22a   : > { %v2245_v36 = vpack.c.bf16 %v1384_v29, %v1384_v29  ;;  %v1385_v39 = vmax.f32 %v1379_v33, 0.0  ;;  %v1254_v40 = vpop.f32.mrb[6].mxu1  ;;  %v1485_v29 = vld [vmem:[#allocation4 + $0x14] sm:$0x1] }
 0x22b   : > { %v1255_v41 = vadd.f32 %v1254_v40, %v1165_v14  ;;  %v2298_v43 = vpop.f32.mrb[7].mxu1  ;;  %v1350_v13 = vpop.f32.mrb[16].mxu0  ;;  %v1488_v40 = vld [vmem:[#allocation4 + $0x18] sm:$0xf] }
 0x22c   : > { %v1409_v45 = vshrl.u32 %v2245_v36, 16  ;;  %v2246_v47 = vpack.c.bf16 %v1385_v39, %v1385_v39  ;;  %v1367_v48 = vadd.f32 %v1350_v13, %v1252_v26  ;;  %v2311_v50 = vpop.f32.mrb[17].mxu0  ;;  %v1412_v54 = vshll.u32 %v2245_v36, 16 }
 0x22d   : > { %v1353_v52 = vpop.f32.mrb[18].mxu0 }
 0x22e   : > { %v1411_v53 = vrot.slane %v1409_v45, 7  ;;  %v1417_v34 = vshrl.u32 %v2246_v47, 16  ;;  %v1380_v55 = vadd.f32 %v2951_v28, %v1367_v48  ;;  %v2312_v56 = vpop.f32.mrb[19].mxu0  ;;  %v1420_v37 = vshll.u32 %v2246_v47, 16 }
 0x22f   : > { %v1368_v60 = vadd.f32 %v1353_v52, %v1255_v41  ;;  %v1491_v41 = vld [vmem:[#allocation4 + $0x1c] sm:$0x1] }
 0x230   : > { %v1414_v61 = vor.u32 %v1412_v54, %v1411_v53  ;;  %v1415_v62 = vrot.slane %v1411_v53, 4  ;;  %v1419_v63 = vrot.slane %v1417_v34, 7  ;;  %v1386_v1 = vmax.f32 %v1380_v55, 0.0  ;;  %v1259_v2 = vpop.f32.mrb[8].mxu1 }
 0x231   : > { %v1381_v5 = vadd.f32 %v2951_v28, %v1368_v60  ;;  %v1260_v59 = vadd.f32 %v1259_v2, %v1170_v16  ;;  %v2301_v6 = vpop.f32.mrb[9].mxu1 }
 0x232   : > { %v1471_v0 = vsel %vm2958_vm9, %v1414_v61, %v1470_v57  ;;  %v1474_v7 = vsel %vm2914_vm7, %v1415_v62, %v1473_v58  ;;  %v1422_v8 = vor.u32 %v1420_v37, %v1419_v63  ;;  %v1423_v19 = vrot.slane %v1419_v63, 4  ;;  %v1262_v12 = vpop.f32.mrb[10].mxu1  ;;  %v1494_v57 = vld [vmem:[#allocation4 + $0x20] sm:$0xf]  ;;  %v1497_v58 = vld [vmem:[#allocation4 + $0x24] sm:$0x1] }
 0x233   : > { %1472 = vst [vmem:[#allocation4] sm:$0xf] %v1471_v0  ;;  %1475 = vst [vmem:[#allocation4 + $0x4] sm:$0x1] %v1474_v7  ;;  %v2247_v14 = vpack.c.bf16 %v1386_v1, %v1386_v1  ;;  %v1387_v15 = vmax.f32 %v1381_v5, 0.0  ;;  %v1263_v9 = vadd.f32 %v1262_v12, %v1173_v49  ;;  %v2302_v17 = vpop.f32.mrb[11].mxu1 }
 0x234   : > { %v1358_v22 = vpop.f32.mrb[20].mxu0  ;;  %v1477_v16 = vsel %vm2958_vm9, %v1422_v8, %v1476_v3  ;;  %v1480_v18 = vsel %vm2914_vm7, %v1423_v19, %v1479_v4  ;;  %v1500_v63 = vld [vmem:[#allocation4 + $0x28] sm:$0xf]  ;;  %v1503_v1 = vld [vmem:[#allocation4 + $0x2c] sm:$0x1]  ;;  %v2469_v0 = vmov (!%p2204_p0), 0  }
 0x235   : > { %v1369_v20 = vadd.f32 %v1358_v22, %v1260_v59  ;;  %v2315_v23 = vpop.f32.mrb[21].mxu0  ;;  %1478 = vst [vmem:[#allocation4 + $0x8] sm:$0xf] %v1477_v16  ;;  %1481 = vst [vmem:[#allocation4 + $0xc] sm:$0x1] %v1480_v18  ;;  %v1425_v24 = vshrl.u32 %v2247_v14, 16  ;;  %v2248_v25 = vpack.c.bf16 %v1387_v15, %v1387_v15 }
 0x236   : > { %v1361_v27 = vpop.f32.mrb[22].mxu0  ;;  %v1428_v42 = vshll.u32 %v2247_v14, 16  ;;  %1511 = vst.msk [vmem:[#allocation4] sm:$0xf] (!%p2204_p0), %vm1468_vm1, %v2469_v0 }
 0x237   : > { %v1382_v11 = vadd.f32 %v2951_v28, %v1369_v20  ;;  %v1370_v30 = vadd.f32 %v1361_v27, %v1263_v9  ;;  %v2316_v21 = vpop.f32.mrb[23].mxu0  ;;  %v1427_v49 = vrot.slane %v1425_v24, 7  ;;  %v1433_v31 = vshrl.u32 %v2248_v25, 16  ;;  %1513 = vst.msk [vmem:[#allocation4 + $0x4] sm:$0x1] (!%p2204_p0), %vm500_vm6, %v2469_v0 }
 0x238   : > { %v1436_v39 = vshll.u32 %v2248_v25, 16 }
 0x239   : > { %v1388_v33 = vmax.f32 %v1382_v11, 0.0  ;;  %v1383_v35 = vadd.f32 %v2951_v28, %v1370_v30  ;;  %v1430_v26 = vor.u32 %v1428_v42, %v1427_v49  ;;  %v1431_v10 = vrot.slane %v1427_v49, 4 }
 0x23a   : > { %v1435_v36 = vrot.slane %v1433_v31, 7 }
 0x23b   : > { %v2249_v43 = vpack.c.bf16 %v1388_v33, %v1388_v33  ;;  %v1389_v13 = vmax.f32 %v1383_v35, 0.0  ;;  %v1483_v45 = vsel %vm2958_vm9, %v1430_v26, %v1482_v32  ;;  %v1486_v47 = vsel %vm2914_vm7, %v1431_v10, %v1485_v29 }
 0x23c   : > { %v1438_v48 = vor.u32 %v1436_v39, %v1435_v36  ;;  %v1439_v50 = vrot.slane %v1435_v36, 4  ;;  %1484 = vst [vmem:[#allocation4 + $0x10] sm:$0xf] %v1483_v45  ;;  %1487 = vst [vmem:[#allocation4 + $0x14] sm:$0x1] %v1486_v47 }
 0x23d   : > { %v1441_v52 = vshrl.u32 %v2249_v43, 16  ;;  %v2250_v28 = vpack.c.bf16 %v1389_v13, %v1389_v13  ;;  %v1444_v55 = vshll.u32 %v2249_v43, 16 }
 0x23e   : > { %v1489_v53 = vsel %vm2958_vm9, %v1438_v48, %v1488_v40  ;;  %v1492_v54 = vsel %vm2914_vm7, %v1439_v50, %v1491_v41 }
 0x23f   : > { %1490 = vst [vmem:[#allocation4 + $0x18] sm:$0xf] %v1489_v53  ;;  %1493 = vst [vmem:[#allocation4 + $0x1c] sm:$0x1] %v1492_v54  ;;  %v1443_v34 = vrot.slane %v1441_v52, 7  ;;  %v1449_v56 = vshrl.u32 %v2250_v28, 16 }
 0x240   : > { %v1452_v62 = vshll.u32 %v2250_v28, 16  ;;  %1509 = sbr.rel (%p2204_p0) target bundleno = 583 (0x247), region = 52 }
 0x241   : > { %v1446_v37 = vor.u32 %v1444_v55, %v1443_v34  ;;  %v1447_v60 = vrot.slane %v1443_v34, 4  ;;  %v1451_v61 = vrot.slane %v1449_v56, 7 }
 0x243   : > { %v1495_v2 = vsel %vm2958_vm9, %v1446_v37, %v1494_v57  ;;  %v1498_v3 = vsel %vm2914_vm7, %v1447_v60, %v1497_v58  ;;  %v1454_v4 = vor.u32 %v1452_v62, %v1451_v61  ;;  %v1455_v5 = vrot.slane %v1451_v61, 4 }
 0x244   : > { %1496 = vst [vmem:[#allocation4 + $0x20] sm:$0xf] %v1495_v2  ;;  %1499 = vst [vmem:[#allocation4 + $0x24] sm:$0x1] %v1498_v3 }
 0x245   : > { %v1501_v59 = vsel %vm2958_vm9, %v1454_v4, %v1500_v63  ;;  %v1504_v6 = vsel %vm2914_vm7, %v1455_v5, %v1503_v1 }
 0x246   : > { %1502 = vst [vmem:[#allocation4 + $0x28] sm:$0xf] %v1501_v59  ;;  %1505 = vst [vmem:[#allocation4 + $0x2c] sm:$0x1] %v1504_v6 }
 0x247 PF: > { %p2205_p1 = scmp.ne.s32.totalorder %s2446_s24, 1 }
 0x248   : > { %v2470_v7 = vmov (!%p2205_p1), 0  }
 0x249   : > { %1517 = sbr.rel (%p2205_p1) target bundleno = 592 (0x250), region = 56  ;;  %1520 = vst.msk [vmem:[#allocation4 + $0x28] sm:$0xf] (!%p2205_p1), %vm1468_vm1, %v2470_v7 }
 0x24a   : > { %1522 = vst.msk [vmem:[#allocation4 + $0x2c] sm:$0x1] (!%p2205_p1), %vm500_vm6, %v2470_v7 }
 0x250 PF: > { %v1661_v46 = vld [vmem:[#allocation4 + $0x10] sm:$0xe]  ;;  %v1662_v44 = vld [vmem:[#allocation4 + $0x14] sm:$0x1]  ;;  %v1659_v12 = vld [vmem:[#allocation4 + $0x8] sm:$0xe] }
 0x251   : > { %v2208_v8 = vrot.slane %v1661_v46, 9  ;;  %v1691_v19 = vrot.slane %v1662_v44, 5  ;;  %v1660_v14 = vld [vmem:[#allocation4 + $0xc] sm:$0x1]  ;;  %v2207_v15 = vrot.slane %v1659_v12, 9  ;;  %s2471_s24 = smov 16  }
 0x252   : > { %v1687_v9 = vrot.slane %v1660_v14, 5  ;;  %v1542_v17 = vld [vmem:[#allocation4 + $0x18] sm:$0xf]  ;;  %v1543_v22 = vld [vmem:[#allocation4 + $0x1c] sm:$0x1]  ;;  %v2412_v45 = vld [vmem:[%s3106_s5 + $0xc] sm:$0xff]  }
 0x253   : > { %v1692_v16 = vsel %vm2753_vm14, %v2208_v8, %v1691_v19  ;;  %v1591_v18 = vshrl.u32 %v1542_v17, 16  ;;  %v1594_v20 = vshll.u32 %v1542_v17, 16  ;;  %v1600_v23 = vshll.u32 %v1543_v22, 16  ;;  %v1538_v24 = vld [vmem:[#allocation4 + $0x8] sm:$0xf]  ;;  %2317 = vmatprep.subr.bf16.mxu1 %v2412_v45 }
 0x254   : > { %1709 = vrot.lane.b32.xlu1 %v1692_v16, %s2471_s24  ;;  %v1688_v25 = vsel %vm2753_vm14, %v2207_v15, %v1687_v9  ;;  %v1539_v27 = vld [vmem:[#allocation4 + $0xc] sm:$0x1]  ;;  %v1563_v11 = vshrl.u32 %v1538_v24, 16  ;;  %v1566_v30 = vshll.u32 %v1538_v24, 16  ;;  %v1544_v21 = vld [vmem:[#allocation4 + $0x20] sm:$0xf]  ;;  %2318 = vmatpush3.bf16.msra.mxu1 %v2412_v45 }
 0x255   : > { %1707 = vrot.lane.b32.xlu0 %v1688_v25, %s2471_s24  ;;  %v1593_v49 = vrot.slane %v1591_v18, 4  ;;  %v1596_v42 = vrot.slane %v1594_v20, 5  ;;  %v1602_v31 = vrot.slane %v1600_v23, 5  ;;  %v1572_v32 = vshll.u32 %v1539_v27, 16  ;;  %v1545_v29 = vld [vmem:[#allocation4 + $0x24] sm:$0x1] }
 0x256   : > { %v1565_v33 = vrot.slane %v1563_v11, 4  ;;  %v1568_v35 = vrot.slane %v1566_v30, 5  ;;  %v1605_v26 = vshrl.u32 %v1544_v21, 16  ;;  %v1608_v10 = vshll.u32 %v1544_v21, 16  ;;  %v1540_v36 = vld [vmem:[#allocation4 + $0x10] sm:$0xf] }
 0x257   : > { %v1597_v39 = vor.u32 %v1596_v42, %v1593_v49  ;;  %v1574_v40 = vrot.slane %v1572_v32, 5  ;;  %v1614_v41 = vshll.u32 %v1545_v29, 16  ;;  %v1541_v43 = vld [vmem:[#allocation4 + $0x14] sm:$0x1]  ;;  %v1577_v13 = vshrl.u32 %v1540_v36, 16 }
 0x258   : > { %v1569_v47 = vor.u32 %v1568_v35, %v1565_v33  ;;  %v1607_v48 = vrot.slane %v1605_v26, 4  ;;  %v1610_v50 = vrot.slane %v1608_v10, 5  ;;  %v1580_v52 = vshll.u32 %v1540_v36, 16  ;;  %v1665_v28 = vld [vmem:[#allocation4 + $0x20] sm:$0xe] }
 0x259   : > { %v1598_v53 = vrot.slane %v1597_v39, 4  ;;  %v1579_v54 = vrot.slane %v1577_v13, 4  ;;  %v1586_v34 = vshll.u32 %v1541_v43, 16  ;;  %v1666_v55 = vld [vmem:[#allocation4 + $0x24] sm:$0x1]  ;;  %v1616_v58 = vrot.slane %v1614_v41, 5 }
 0x25a   : > { %v1570_v56 = vrot.slane %v1569_v47, 4  ;;  %v1611_v57 = vor.u32 %v1610_v50, %v1607_v48  ;;  %v1582_v37 = vrot.slane %v1580_v52, 5  ;;  %v1663_v60 = vld [vmem:[#allocation4 + $0x18] sm:$0xe]  ;;  %v2210_v63 = vrot.slane %v1665_v28, 9 }
 0x25b   : > { %v1603_v61 = vsel %vm2728_vm12, %v1598_v53, %v1602_v31  ;;  %v1588_v62 = vrot.slane %v1586_v34, 5  ;;  %v1699_v1 = vrot.slane %v1666_v55, 5  ;;  %v1664_v2 = vld [vmem:[#allocation4 + $0x1c] sm:$0x1]  ;;  %v2209_v59 = vrot.slane %v1663_v60, 9  ;;  %v2415_v53 = vld [vmem:[%s3106_s5] sm:$0xff]  }
 0x25c   : > { %1638 = vrot.lane.b32.xlu1 %v1603_v61, %s2466_s25  ;;  %v1575_v3 = vsel %vm2728_vm12, %v1570_v56, %v1574_v40  ;;  %v1612_v4 = vrot.slane %v1611_v57, 4  ;;  %v1583_v5 = vor.u32 %v1582_v37, %v1579_v54  ;;  %v1536_v6 = vld [vmem:[#allocation4] sm:$0xf]  ;;  %v1537_v0 = vld [vmem:[#allocation4 + $0x4] sm:$0x1]  ;;  %v1695_v7 = vrot.slane %v1664_v2, 5 }
 0x25d   : > { %1634 = vrot.lane.b32.xlu0 %v1575_v3, %s2466_s25  ;;  %v1549_v46 = vshrl.u32 %v1536_v6, 16  ;;  %v1552_v44 = vshll.u32 %v1536_v6, 16  ;;  %v1558_v8 = vshll.u32 %v1537_v0, 16  ;;  %v1657_v19 = vld [vmem:[#allocation4] sm:$0xe]  ;;  %v1700_v17 = vsel %vm2753_vm14, %v2210_v63, %v1699_v1 }
 0x25e   : > { %v1617_v12 = vsel %vm2728_vm12, %v1612_v4, %v1616_v58  ;;  %v1584_v14 = vrot.slane %v1583_v5, 4  ;;  %v1658_v15 = vld [vmem:[#allocation4 + $0x4] sm:$0x1]  ;;  %v1546_v9 = vld [vmem:[#allocation4 + $0x28] sm:$0xf]  ;;  %v2206_v18 = vrot.slane %v1657_v19, 9  ;;  %v1696_v30 = vsel %vm2753_vm14, %v2209_v59, %v1695_v7 }
 0x25f   : > { %v1551_v22 = vrot.slane %v1549_v46, 4  ;;  %v1554_v16 = vrot.slane %v1552_v44, 5  ;;  %v1547_v20 = vld [vmem:[#allocation4 + $0x2c] sm:$0x1]  ;;  %v1560_v24 = vrot.slane %v1558_v8, 5  ;;  %v1619_v25 = vshrl.u32 %v1546_v9, 16 }
 0x260   : > { %1640 = vrot.lane.b32.xlu1 %v1617_v12, %s2466_s25  ;;  %v1589_v23 = vsel %vm2728_vm12, %v1584_v14, %v1588_v62  ;;  %v1622_v27 = vshll.u32 %v1546_v9, 16  ;;  %v1667_v11 = vld [vmem:[#allocation4 + $0x28] sm:$0xe]  ;;  %v1683_v49 = vrot.slane %v1658_v15, 5  ;;  %v1628_v42 = vshll.u32 %v1547_v20, 16  ;;  %v2419_v59 = vld [vmem:[%s3106_s5 + $0x18] sm:$0xff]  }
 0x261   : > { %1636 = vrot.lane.b32.xlu0 %v1589_v23, %s2466_s25  ;;  %v1555_v21 = vor.u32 %v1554_v16, %v1551_v22  ;;  %v1668_v31 = vld [vmem:[#allocation4 + $0x2c] sm:$0x1]  ;;  %v1526_v32 = vld [vmem:[#allocation4 + $0x18] sm:$0xf]  ;;  %v1621_v29 = vrot.slane %v1619_v25, 4  ;;  %v2211_v35 = vrot.slane %v1667_v11, 9 }
 0x262   : > { %v1624_v33 = vrot.slane %v1622_v27, 5  ;;  %v1703_v26 = vrot.slane %v1668_v31, 5  ;;  %1533 = vst.msk [vmem:[#allocation5 + $0xc] sm:$0xf] %vm1468_vm1, %v1526_v32  ;;  %v1524_v10 = vld [vmem:[#allocation4 + $0x8] sm:$0xf]  ;;  %v1684_v13 = vsel %vm2753_vm14, %v2206_v18, %v1683_v49 }
 0x263   : > { %v1556_v36 = vrot.slane %v1555_v21, 4  ;;  %1531 = vst.msk [vmem:[#allocation5 + $0x4] sm:$0xf] %vm1468_vm1, %v1524_v10  ;;  %v1527_v39 = vld [vmem:[#allocation4 + $0x20] sm:$0xf]  ;;  %vm1772_vm3 = vcmask 1043456  }
 0x264   : > { %v1525_v40 = vld [vmem:[#allocation4 + $0x10] sm:$0xf]  ;;  %1713 = vrot.lane.b32.xlu1 %v1700_v17, %s2471_s24  ;;  %v1625_v41 = vor.u32 %v1624_v33, %v1621_v29  ;;  %1534 = vst.msk [vmem:[#allocation5 + $0x10] sm:$0xf] %vm1468_vm1, %v1527_v39  ;;  %v1523_v43 = vld [vmem:[#allocation4] sm:$0xf]  ;;  %v1704_v54 = vsel %vm2753_vm14, %v2211_v35, %v1703_v26 }
 0x265   : > { %1532 = vst.msk [vmem:[#allocation5 + $0x8] sm:$0xf] %vm1468_vm1, %v1525_v40  ;;  %1711 = vrot.lane.b32.xlu0 %v1696_v30, %s2471_s24  ;;  %1530 = vst.msk [vmem:[#allocation5] sm:$0xf] %vm1468_vm1, %v1523_v43  ;;  %v2413_v45 = vld [vmem:[%s3106_s5 + $0x14] ss:$0 sps:$4 sm:$0xff]   ;;  %v1561_v48 = vsel %vm2728_vm12, %v1556_v36, %v1560_v24 }
 0x266   : > { %v1528_v47 = vld [vmem:[#allocation4 + $0x28] sm:$0xf]  ;;  %v1626_v50 = vrot.slane %v1625_v41, 4  ;;  %v1630_v52 = vrot.slane %v1628_v42, 5  ;;  %2349 = vmatprep.subr.msk.bf16.mxu1 %vm1772_vm3, %v2413_v45  ;;  %v1774_v28 = vsel %vm1772_vm3, %v2413_v45, 0  ;;  %vm1650_vm10 = vcmask 126016  }
 0x267   : > { %1535 = vst.msk [vmem:[#allocation5 + $0x14] sm:$0xf] %vm1468_vm1, %v1528_v47  ;;  %2320 = vmatpush3.bf16.msra.mxu1 %v1774_v28  ;;  %vm1723_vm11 = vcmask 191616   ;;  %v2417_v2 = vld [vmem:[%s3106_s5 + $0x8] ss:$0 sps:$4 sm:$0xff]   ;;  %vm2007_vm13 = vcmask 64512  }
 0x268   : > { %1705 = vrot.lane.b32.xlu1 %v1684_v13, %s2471_s24  ;;  %2325 = vmatprep.subr.bf16.mxu1 %v2415_v53  ;;  %v1631_v34 = vsel %vm2728_vm12, %v1626_v50, %v1630_v52  ;;  %vm1765_vm12 = vcmask 195584   ;;  %v1851_v5 = vsel %vm1772_vm3, %v2417_v2, 0  ;;  %v2422_v7 = vld [vmem:[%s3106_s5 + $0x20] ss:$0 sps:$4 sm:$0xff]  }
 0x269   : > { %1632 = vrot.lane.b32.xlu0 %v1561_v48, %s2466_s25  ;;  %v1937_v44 = vsel %vm1772_vm3, %v2422_v7, 0  ;;  %v2236_v19 = vld [vmem:[%s3107_s6] ss:$0 sm:$0xff] }
 0x26c   : > { %1715 = vrot.lane.b32.xlu1 %v1704_v54, %s2471_s24 }
 0x26d   : > { %1642 = vrot.lane.b32.xlu0 %v1631_v34, %s2466_s25 }
 0x2c6   : > { %v1710_v55 = vpop.permute.xlu1 %1709 }
 0x2c7   : > { %v1708_v56 = vpop.permute.xlu0 %1707 }
 0x2ce   : > { %v1639_v57 = vpop.permute.xlu1 %1638 }
 0x2cf   : > { %1654 = vst.msk [vmem:[#allocation5 + $0xc] sm:$0xf] %vm1650_vm10, %v1639_v57  ;;  %v1635_v58 = vpop.permute.xlu0 %1634 }
 0x2d0   : > { %1652 = vst.msk [vmem:[#allocation5 + $0x4] sm:$0xf] %vm1650_vm10, %v1635_v58 }
 0x2d1   : > { %1725 = vst.msk [vmem:[#allocation5 + $0x4] sm:$0xf] %vm1723_vm11, %v1708_v56 }
 0x2d2   : > { %v1641_v38 = vpop.permute.xlu1 %1640 }
 0x2d3   : > { %1655 = vst.msk [vmem:[#allocation5 + $0x10] sm:$0xf] %vm1650_vm10, %v1641_v38  ;;  %v1637_v51 = vpop.permute.xlu0 %1636 }
 0x2d4   : > { %1653 = vst.msk [vmem:[#allocation5 + $0x8] sm:$0xf] %vm1650_vm10, %v1637_v51 }
 0x2d5   : > { %1726 = vst.msk [vmem:[#allocation5 + $0x8] sm:$0xf] %vm1723_vm11, %v1710_v55 }
 0x2d6   : > { %v1714_v37 = vpop.permute.xlu1 %1713 }
 0x2d7   : > { %1728 = vst.msk [vmem:[#allocation5 + $0x10] sm:$0xf] %vm1723_vm11, %v1714_v37  ;;  %v1712_v60 = vpop.permute.xlu0 %1711 }
 0x2d8   : > { %1727 = vst.msk [vmem:[#allocation5 + $0xc] sm:$0xf] %vm1723_vm11, %v1712_v60 }
 0x2da   : > { %v1706_v61 = vpop.permute.xlu1 %1705 }
 0x2db   : > { %v1633_v62 = vpop.permute.xlu0 %1632 }
 0x2dc   : > { %1651 = vst.msk [vmem:[#allocation5] sm:$0xf] %vm1650_vm10, %v1633_v62  ;;  %v2414_v63 = vld [vmem:[#allocation5 + $0x4] sm:$0xff]  }
 0x2dd   : > { %1724 = vst.msk [vmem:[#allocation5] sm:$0xf] %vm1723_vm11, %v1706_v61  ;;  %2321 = vmatprep.mubr.msk.bf16.mxu1 %vm1765_vm12, %v2414_v63 }
 0x2de   : > { %v1716_v1 = vpop.permute.xlu1 %1715 }
 0x2df   : > { %v1643_v3 = vpop.permute.xlu0 %1642  ;;  %v2416_v4 = vld [vmem:[#allocation5 + $0xc] sm:$0xff]  }
 0x2e0   : > { %1656 = vst.msk [vmem:[#allocation5 + $0x14] sm:$0xf] %vm1650_vm10, %v1643_v3  ;;  %2322 = vmatmul.mubr.msk.bf16.vlgmr.msra.gmra.mrb[12].mxu1 %vm1765_vm12, %v2416_v4  ;;  %v2420_v0 = vld [vmem:[#allocation5 + $0x8] sm:$0xff]  }
 0x2e1   : > { %1729 = vst.msk [vmem:[#allocation5 + $0x14] sm:$0xf] %vm1723_vm11, %v1716_v1  ;;  %2326 = vmatpush3.bf16.msra.mxu1 %v2415_v53  ;;  %v2421_v46 = vld [vmem:[#allocation5 + $0x8] sm:$0xff]  }
 0x2e2   : > { %2350 = vmatprep.subr.msk.bf16.mxu1 %vm1772_vm3, %v2417_v2 }
 0x2e4   : > { %v2418_v6 = vld [vmem:[#allocation5] sm:$0xff]  }
 0x2e5   : > { %2329 = vmatprep.mubr.msk.bf16.mxu1 %vm1765_vm12, %v2418_v6  ;;  %2328 = vmatpush3.bf16.msra.mxu1 %v1851_v5 }
 0x2e6   : > { %2333 = vmatprep.subr.bf16.mxu1 %v2419_v59 }
 0x2e8   : > { %v2423_v8 = vld [vmem:[#allocation5 + $0x10] sm:$0xff]  }
 0x2ec   : > { %2330 = vmatmul.mubr.msk.bf16.vlgmr.msra.gmra.mrb[12].mxu1 %vm1765_vm12, %v2420_v0 }
 0x2ed   : > { %2334 = vmatpush3.bf16.msra.mxu1 %v2419_v59  ;;  %2337 = vmatprep.mubr.msk.bf16.mxu1 %vm1765_vm12, %v2421_v46 }
 0x2ee   : > { %2351 = vmatprep.subr.msk.bf16.mxu1 %vm1772_vm3, %v2422_v7 }
 0x2f1   : > { %2336 = vmatpush3.bf16.msra.mxu1 %v1937_v44 }
 0x2f8   : > { %2338 = vmatmul.mubr.msk.bf16.vlgmr.msra.gmra.mrb[12].mxu1 %vm1765_vm12, %v2423_v8 }
 0x3cb   : > { %v2339_v12 = vpop.f32.mrb[12].mxu1 }
 0x3cc   : > { %v2001_v14 = vadd.f32 %v2339_v12, %v2236_v19  ;;  %v1973_v15 = vpop.f32.mrb[13].mxu1 }
 0x3cd   : > { %v1999_v9 = vadd.f32 %v2236_v19, %v1973_v15  ;;  %v2340_v17 = vpop.f32.mrb[14].mxu1 }
 0x3ce   : > { %v2005_v22 = vmax.f32 %v2001_v14, 0.0  ;;  %v2002_v16 = vadd.f32 %v2340_v17, %v2236_v19  ;;  %v1976_v18 = vpop.f32.mrb[15].mxu1 }
 0x3cf   : > { %v2003_v20 = vmax.f32 %v1999_v9, 0.0  ;;  %v2000_v23 = vadd.f32 %v2236_v19, %v1976_v18 }
 0x3d0   : > { %2010 = vst.msk [vmem:[%s2580_s8 + $0x10] sm:$0xff] %vm2007_vm13, %v2005_v22  ;;  %v2006_v24 = vmax.f32 %v2002_v16, 0.0 }
 0x3d1   : > { %2008 = vst.msk [vmem:[%s2580_s8] sm:$0xff] %vm2007_vm13, %v2003_v20  ;;  %v2004_v25 = vmax.f32 %v2000_v23, 0.0 }
 0x3d2   : > { %2011 = vst.msk [vmem:[%s2580_s8 + $0x18] sm:$0xff] %vm2007_vm13, %v2006_v24 }
 0x3d3   : > { %2009 = vst.msk [vmem:[%s2580_s8 + $0x8] sm:$0xff] %vm2007_vm13, %v2004_v25 }
 0x3d4 PF: > { %s17_s28 = sadd.s32 1, %s2462_s28   ;;  %s3129_s24 = smov %s2454_s26 }
 0x3d5   : > { %p14_p2 = scmp.ge.s32.totalorder %s17_s28, 6   ;;  %s3130_s25 = smov %s2458_s27 }
 0x3d6   : > { %s3131_s26 = smov %s3134_s29  ;;  %s3132_s27 = smov %s3138_s30 }
 0x3d7   :  { %16 = sbr.rel (!%p14_p2) target bundleno = 3 (0x3), region = 103 }

</bundles_post_ra>
